<compile_context>
chip_gen: v5e
topology: v5e:2x2
jax: 0.10.0
libtpu: 0.0.40
codegen_flags: <defaults>
</compile_context>

<pallas_src>
import functools
import math

import jax
import jax.numpy as jnp
import numpy as np
from jax.experimental import pallas as pl
from jax.experimental.pallas import tpu as pltpu


# ----------------------------- rotary tables ------------------------------ #
def make_axial_pos(h, w):
    h_pos = jnp.linspace(-1.0, 1.0, h + 1)
    w_pos = jnp.linspace(-1.0, 1.0, w + 1)
    h_pos = (h_pos[:-1] + h_pos[1:]) / 2
    w_pos = (w_pos[:-1] + w_pos[1:]) / 2
    hh, ww = jnp.meshgrid(h_pos, w_pos, indexing="ij")
    return jnp.stack([hh, ww], axis=-1).reshape(h * w, 2)


def make_rotary_tables(head_dim):
    log_min = math.log(math.pi)
    log_max = math.log(10 * math.pi)
    freqs = jnp.exp(jnp.linspace(log_min, log_max, head_dim // 8 + 1)[:-1])
    pos = make_axial_pos(32, 32)                        # (1024, 2)
    pos = jnp.concatenate([jnp.zeros((1, 2)), pos], 0)  # (1025, 2)
    theta_h = pos[:, 0:1] * freqs
    theta_w = pos[:, 1:2] * freqs
    theta = jnp.concatenate([theta_h, theta_w], axis=-1)  # (1025, head_dim//4)
    return jnp.cos(theta), jnp.sin(theta)


# ------------------------------ Pallas kernel ------------------------------ #
def _self_attention_kernel(x_ref, gamma_ref, beta_ref, wqkv_ref, wout_ref,
                           rot_ref, o_ref, acc_ref,
                           *, n_heads, head_dim, rot_half):
    L = x_ref.shape[1]

    # ---- LayerNorm over dim (f32 elementwise, eps = 1e-5) ----
    x = x_ref[0].astype(jnp.float32)                        # (L, D)
    mean = jnp.mean(x, axis=-1, keepdims=True)
    xc = x - mean
    var = jnp.mean(xc * xc, axis=-1, keepdims=True)
    xn = (xc * jax.lax.rsqrt(var + 1e-5)) * gamma_ref[0] + beta_ref[0]
    xn_b = xn.astype(jnp.bfloat16)

    # Per-head rotary tables (L, head_dim).  The sin tables are exactly zero
    # outside the rotary dims, so the jnp.roll wrap-around (confined to a
    # single head here) contributes nothing -- see prepare_params.
    cosf = rot_ref[0]   # cos on rotary dims, 1 elsewhere
    sinf = rot_ref[1]   # -sin on first-half rotary dims, 0 elsewhere
    sinb = rot_ref[2]   # +sin on second-half rotary dims, 0 elsewhere

    def rotary(t):      # (L, head_dim) f32
        return (t * cosf
                + jnp.roll(t, -rot_half, axis=-1) * sinf
                + jnp.roll(t, rot_half, axis=-1) * sinb)

    # Causal mask built in-kernel once per grid step (hoisted out of the head
    # loop): no (L, L) bias input, no HBM traffic for a constant.
    row_ids = jax.lax.broadcasted_iota(jnp.int32, (L, 1), 0)
    col_ids = jax.lax.broadcasted_iota(jnp.int32, (1, L), 1)
    causal = col_ids <= row_ids                             # (L, L) bool

    # f32 output accumulator (scratch persists across grid steps -> re-zero).
    acc_ref[...] = jnp.zeros_like(acc_ref)

    dn_qkt = (((1,), (1,)), ((), ()))        # contract last dims: q @ k^T

    def head_body(h, carry):
        # Fused per-head q/k/v projection: (L, D) @ (D, 3*hd), bf16 -> f32 acc.
        # (1/sqrt(head_dim) is already folded into the q columns.)
        qkv_h = jnp.dot(xn_b, wqkv_ref[h],
                        preferred_element_type=jnp.float32)       # (L, 3*hd)
        qh = rotary(qkv_h[:, :head_dim]).astype(jnp.bfloat16)
        kh = rotary(qkv_h[:, head_dim:2 * head_dim]).astype(jnp.bfloat16)
        vh = qkv_h[:, 2 * head_dim:].astype(jnp.bfloat16)

        s = jax.lax.dot_general(qh, kh, dn_qkt,
                                preferred_element_type=jnp.float32)  # (L, L)
        s = jnp.where(causal, s, -1e30)
        m = jnp.max(s, axis=-1, keepdims=True)
        p = jnp.exp(s - m)                                   # un-normalized
        l = jnp.sum(p, axis=-1, keepdims=True)               # (L, 1) f32
        o_h = jnp.dot(p.astype(jnp.bfloat16), vh,
                      preferred_element_type=jnp.float32)    # (L, hd)
        # Deferred normalization: scale the (L, hd) output, not the (L, L)
        # probabilities; row sum and scaling stay f32.
        o_h = o_h * pl.reciprocal(l, approx=True)

        # Per-head out-projection, accumulated (no attn-slab scratch / reload).
        acc_ref[...] += jnp.dot(o_h.astype(jnp.bfloat16), wout_ref[h],
                                preferred_element_type=jnp.float32)
        return carry

    jax.lax.fori_loop(0, n_heads, head_body, 0)

    o_ref[0] = acc_ref[...].astype(o_ref.dtype)


# --------------------------- one-time param prep ---------------------------- #
def prepare_params(gamma, beta, w_qkv, w_out, head_dim, seq_len):
    """Hoisted (call-once) prep: per-head transposed bf16 weights, folded
    1/sqrt(head_dim) scale, and per-head-width rotary tables."""
    D = gamma.shape[0]
    H = D // head_dim
    r2 = head_dim // 4          # rotary acts on the first 2*r2 dims of a head
    rest = head_dim - 2 * r2

    cos, sin = make_rotary_tables(head_dim)            # (1025, r2)
    assert seq_len <= cos.shape[0], "sequence longer than rotary table (1025)"
    cos_l = cos[:seq_len].astype(jnp.float32)
    sin_l = sin[:seq_len].astype(jnp.float32)

    # Per-head-width (L, head_dim) rotary tables; sin parts are zero outside
    # the rotary dims so the in-kernel roll wrap-around is harmless.
    ones_r = jnp.ones((seq_len, rest), jnp.float32)
    zeros_r2 = jnp.zeros((seq_len, r2), jnp.float32)
    zeros_rest = jnp.zeros((seq_len, rest), jnp.float32)
    cos_head = jnp.concatenate([cos_l, cos_l, ones_r], axis=-1)
    sinf_head = jnp.concatenate([-sin_l, zeros_r2, zeros_rest], axis=-1)
    sinb_head = jnp.concatenate([zeros_r2, sin_l, zeros_rest], axis=-1)
    rot = jnp.stack([cos_head, sinf_head, sinb_head], axis=0)   # (3, L, hd) f32

    # Weights: PyTorch Linear layout (out, in) -> transposed, split per head,
    # bf16; scale folded into the q columns (rotary is linear, so it commutes).
    scale = 1.0 / math.sqrt(head_dim)
    wt = jnp.asarray(w_qkv, jnp.float32).T                       # (D, 3D)
    wq = (wt[:, :D] * scale).reshape(D, H, head_dim)
    wk = wt[:, D:2 * D].reshape(D, H, head_dim)
    wv = wt[:, 2 * D:].reshape(D, H, head_dim)
    w_heads = jnp.concatenate([wq, wk, wv], axis=-1)             # (D, H, 3*hd)
    w_heads = jnp.transpose(w_heads, (1, 0, 2)).astype(jnp.bfloat16)  # (H,D,3hd)

    w_out_t = jnp.asarray(w_out, jnp.float32).T                  # (D, D)
    wout_heads = w_out_t.reshape(H, head_dim, D).astype(jnp.bfloat16)  # (H,hd,D)

    gamma2 = jnp.asarray(gamma, jnp.float32).reshape(1, D)
    beta2 = jnp.asarray(beta, jnp.float32).reshape(1, D)
    return gamma2, beta2, w_heads, wout_heads, rot, head_dim


# ------------------------------ wrapper ------------------------------------ #
def self_attention_pallas(x, params):
    """x: (N, L, D).  params: output of prepare_params (reused across calls)."""
    gamma2, beta2, w_heads, wout_heads, rot, head_dim = params
    N, L, D = x.shape
    H = D // head_dim
    assert rot.shape[1] == L and w_heads.shape[0] == H
    r2 = head_dim // 4

    kernel = functools.partial(_self_attention_kernel, n_heads=H,
                               head_dim=head_dim, rot_half=r2)

    return pl.pallas_call(
        kernel,
        out_shape=jax.ShapeDtypeStruct((N, L, D), x.dtype),
        grid=(N,),
        in_specs=[
            pl.BlockSpec((1, L, D), lambda b: (b, 0, 0)),            # x
            pl.BlockSpec((1, D), lambda b: (0, 0)),                  # LN gamma
            pl.BlockSpec((1, D), lambda b: (0, 0)),                  # LN beta
            pl.BlockSpec((H, D, 3 * head_dim), lambda b: (0, 0, 0)), # W_qkv per head (bf16)
            pl.BlockSpec((H, head_dim, D), lambda b: (0, 0, 0)),     # W_out per head (bf16)
            pl.BlockSpec((3, L, head_dim), lambda b: (0, 0, 0)),     # rotary tables
        ],
        out_specs=pl.BlockSpec((1, L, D), lambda b: (b, 0, 0)),
        scratch_shapes=[pltpu.VMEM((L, D), jnp.float32)],            # f32 accumulator
        compiler_params=pltpu.CompilerParams(
            dimension_semantics=("parallel",)),
    )(x, gamma2, beta2, w_heads, wout_heads, rot)


# --------------------------- pure-JAX reference ----------------------------- #
def self_attention_ref(x, gamma, beta, w_qkv, w_out, cos, sin, head_dim):
    N, L, D = x.shape
    H = D // head_dim
    mean = x.mean(-1, keepdims=True)
    var = ((x - mean) ** 2).mean(-1, keepdims=True)
    xn = (x - mean) / jnp.sqrt(var + 1e-5) * gamma + beta
    qkv = xn @ w_qkv.T
    q = qkv[..., :D].reshape(N, L, H, head_dim)
    k = qkv[..., D:2 * D].reshape(N, L, H, head_dim)
    v = qkv[..., 2 * D:].reshape(N, L, H, head_dim)
    r2 = cos.shape[-1]
    c = cos[:L][None, :, None, :]
    s = sin[:L][None, :, None, :]

    def rot(t):
        t1, t2, rest = t[..., :r2], t[..., r2:2 * r2], t[..., 2 * r2:]
        return jnp.concatenate([t1 * c - t2 * s, t1 * s + t2 * c, rest], -1)

    q, k = rot(q), rot(k)
    att = jnp.einsum("nqhd,nkhd->nhqk", q, k) / math.sqrt(head_dim)
    mask = jnp.tril(jnp.ones((L, L), bool))
    att = jnp.where(mask, att, -jnp.inf)
    p = jax.nn.softmax(att, axis=-1)
    o = jnp.einsum("nhqk,nkhd->nqhd", p, v).reshape(N, L, D)
    return o @ w_out.T


# --------------------------------- main ------------------------------------ #
if __name__ == "__main__":
    N, L, dim, head_dim = 2, 64, 64, 16   # eval mode (dropout is a no-op)

    key = jax.random.PRNGKey(0)
    kx, kqkv, kout = jax.random.split(key, 3)

    x = jax.random.normal(kx, (N, L, dim), jnp.float32)
    gamma = jnp.ones((dim,), jnp.float32)             # LayerNorm weight
    beta = jnp.zeros((dim,), jnp.float32)             # LayerNorm bias
    w_qkv = 0.05 * jax.random.normal(kqkv, (3 * dim, dim), jnp.float32)
    w_out_zero = jnp.zeros((dim, dim), jnp.float32)   # zero_init(out_proj)
    cos, sin = make_rotary_tables(head_dim)

    # Faithful module forward (zero-initialized out_proj -> zeros output).
    params0 = prepare_params(gamma, beta, w_qkv, w_out_zero, head_dim, L)
    out = jax.block_until_ready(self_attention_pallas(x, params0))
    ref = self_attention_ref(x, gamma, beta, w_qkv, w_out_zero, cos, sin, head_dim)
    np.testing.assert_allclose(np.asarray(out), np.asarray(ref),
                               rtol=5e-2, atol=1e-2)

    # Exercise the full attention path with a non-zero out_proj.
    # bf16 matmul operands + approx reciprocal => loosened tolerances.
    w_out_rand = 0.05 * jax.random.normal(kout, (dim, dim), jnp.float32)
    params1 = prepare_params(gamma, beta, w_qkv, w_out_rand, head_dim, L)
    out2 = jax.block_until_ready(self_attention_pallas(x, params1))
    ref2 = self_attention_ref(x, gamma, beta, w_qkv, w_out_rand, cos, sin, head_dim)
    np.testing.assert_allclose(np.asarray(out2), np.asarray(ref2),
                               rtol=5e-2, atol=1e-2)

    print("KERNEL_OK")
</pallas_src>

<mosaic_0001>
module attributes {stable_mosaic.version = 11 : i64} {
  func.func @_self_attention_kernel(%arg0: i32, %arg1: memref<1x64x64xf32, #tpu.memory_space<vmem>>, %arg2: memref<1x64xf32, #tpu.memory_space<vmem>>, %arg3: memref<1x64xf32, #tpu.memory_space<vmem>>, %arg4: memref<4x64x48xbf16, #tpu.memory_space<vmem>>, %arg5: memref<4x16x64xbf16, #tpu.memory_space<vmem>>, %arg6: memref<3x64x16xf32, #tpu.memory_space<vmem>>, %arg7: memref<1x64x64xf32, #tpu.memory_space<vmem>>, %arg8: memref<64x64xf32, #tpu.memory_space<vmem>>) attributes {dimension_semantics = [#tpu.dimension_semantics<parallel>], iteration_bounds = array<i64: 2>, scalar_prefetch = 0 : i64, scratch_operands = 1 : i64, tpu.core_type = #tpu.core_type<tc>, window_params = [{transform_indices = @transform_0, window_bounds = array<i64: 1, 64, 64>}, {pipeline_mode = #tpu.pipeline_mode<synchronous>, transform_indices = @transform_1, window_bounds = array<i64: 1, 64>}, {pipeline_mode = #tpu.pipeline_mode<synchronous>, transform_indices = @transform_2, window_bounds = array<i64: 1, 64>}, {pipeline_mode = #tpu.pipeline_mode<synchronous>, transform_indices = @transform_3, window_bounds = array<i64: 4, 64, 48>}, {pipeline_mode = #tpu.pipeline_mode<synchronous>, transform_indices = @transform_4, window_bounds = array<i64: 4, 16, 64>}, {pipeline_mode = #tpu.pipeline_mode<synchronous>, transform_indices = @transform_5, window_bounds = array<i64: 3, 64, 16>}, {transform_indices = @transform_6, window_bounds = array<i64: 1, 64, 64>}]} {
    %c0 = arith.constant 0 : index
    %c0_0 = arith.constant 0 : index
    %c0_1 = arith.constant 0 : index
    %0 = vector.load %arg1[%c0, %c0_0, %c0_1] : memref<1x64x64xf32, #tpu.memory_space<vmem>>, vector<1x64x64xf32>
    %1 = vector.shape_cast %0 : vector<1x64x64xf32> to vector<64x64xf32>
    %cst = arith.constant dense<0.000000e+00> : vector<64xf32>
    %2 = vector.multi_reduction <add>, %1, %cst [1] : vector<64x64xf32> to vector<64xf32>
    %3 = vector.shape_cast %2 : vector<64xf32> to vector<64x1xf32>
    %cst_2 = arith.constant 6.400000e+01 : f32
    %4 = vector.broadcast %cst_2 : f32 to vector<64x1xf32>
    %5 = arith.divf %3, %4 : vector<64x1xf32>
    %6 = vector.broadcast %5 : vector<64x1xf32> to vector<64x64xf32>
    %7 = arith.subf %1, %6 : vector<64x64xf32>
    %8 = arith.mulf %7, %7 : vector<64x64xf32>
    %cst_3 = arith.constant dense<0.000000e+00> : vector<64xf32>
    %9 = vector.multi_reduction <add>, %8, %cst_3 [1] : vector<64x64xf32> to vector<64xf32>
    %10 = vector.shape_cast %9 : vector<64xf32> to vector<64x1xf32>
    %cst_4 = arith.constant 6.400000e+01 : f32
    %11 = vector.broadcast %cst_4 : f32 to vector<64x1xf32>
    %12 = arith.divf %10, %11 : vector<64x1xf32>
    %cst_5 = arith.constant 9.99999974E-6 : f32
    %13 = vector.broadcast %cst_5 : f32 to vector<64x1xf32>
    %14 = arith.addf %12, %13 : vector<64x1xf32>
    %15 = math.rsqrt %14 : vector<64x1xf32>
    %16 = vector.broadcast %15 : vector<64x1xf32> to vector<64x64xf32>
    %17 = arith.mulf %7, %16 : vector<64x64xf32>
    %c0_6 = arith.constant 0 : index
    %c0_7 = arith.constant 0 : index
    %18 = vector.load %arg2[%c0_6, %c0_7] : memref<1x64xf32, #tpu.memory_space<vmem>>, vector<1x64xf32>
    %19 = vector.shape_cast %18 : vector<1x64xf32> to vector<64xf32>
    %20 = vector.shape_cast %19 : vector<64xf32> to vector<1x64xf32>
    %21 = vector.broadcast %20 : vector<1x64xf32> to vector<64x64xf32>
    %22 = arith.mulf %17, %21 : vector<64x64xf32>
    %c0_8 = arith.constant 0 : index
    %c0_9 = arith.constant 0 : index
    %23 = vector.load %arg3[%c0_8, %c0_9] : memref<1x64xf32, #tpu.memory_space<vmem>>, vector<1x64xf32>
    %24 = vector.shape_cast %23 : vector<1x64xf32> to vector<64xf32>
    %25 = vector.shape_cast %24 : vector<64xf32> to vector<1x64xf32>
    %26 = vector.broadcast %25 : vector<1x64xf32> to vector<64x64xf32>
    %27 = arith.addf %22, %26 : vector<64x64xf32>
    %28 = arith.truncf %27 : vector<64x64xf32> to vector<64x64xbf16>
    %c0_10 = arith.constant 0 : index
    %c0_11 = arith.constant 0 : index
    %c0_12 = arith.constant 0 : index
    %29 = vector.load %arg6[%c0_10, %c0_11, %c0_12] : memref<3x64x16xf32, #tpu.memory_space<vmem>>, vector<1x64x16xf32>
    %30 = vector.shape_cast %29 : vector<1x64x16xf32> to vector<64x16xf32>
    %c1 = arith.constant 1 : index
    %c0_13 = arith.constant 0 : index
    %c0_14 = arith.constant 0 : index
    %31 = vector.load %arg6[%c1, %c0_13, %c0_14] : memref<3x64x16xf32, #tpu.memory_space<vmem>>, vector<1x64x16xf32>
    %32 = vector.shape_cast %31 : vector<1x64x16xf32> to vector<64x16xf32>
    %c2 = arith.constant 2 : index
    %c0_15 = arith.constant 0 : index
    %c0_16 = arith.constant 0 : index
    %33 = vector.load %arg6[%c2, %c0_15, %c0_16] : memref<3x64x16xf32, #tpu.memory_space<vmem>>, vector<1x64x16xf32>
    %34 = vector.shape_cast %33 : vector<1x64x16xf32> to vector<64x16xf32>
    %35 = tpu.iota {dimensions = array<i32: 0>} : vector<64x1xi32>
    %36 = tpu.iota {dimensions = array<i32: 1>} : vector<1x64xi32>
    %37 = vector.broadcast %36 : vector<1x64xi32> to vector<64x64xi32>
    %38 = vector.broadcast %35 : vector<64x1xi32> to vector<64x64xi32>
    %39 = arith.cmpi sle, %37, %38 : vector<64x64xi32>
    %cst_17 = arith.constant 0.000000e+00 : f32
    %40 = vector.broadcast %cst_17 : f32 to vector<64x64xf32>
    %c0_18 = arith.constant 0 : index
    %c0_19 = arith.constant 0 : index
    %41 = vector.load %arg8[%c0_18, %c0_19] : memref<64x64xf32, #tpu.memory_space<vmem>>, vector<64x64xf32>
    tpu.vector_store %arg8[%c0_18, %c0_19], %40 {strides = array<i32>} : memref<64x64xf32, #tpu.memory_space<vmem>>, vector<64x64xf32>,
    %c0_i32 = arith.constant 0 : i32
    %c4_i32 = arith.constant 4 : i32
    %42 = arith.addi %c0_i32, %c4_i32 : i32
    %c1_i32 = arith.constant 1 : i32
    scf.for %arg9 = %c0_i32 to %42 step %c1_i32  : i32 {
      %47 = arith.index_cast %arg9 : i32 to index
      %c0_26 = arith.constant 0 : index
      %c0_27 = arith.constant 0 : index
      %48 = vector.load %arg4[%47, %c0_26, %c0_27] : memref<4x64x48xbf16, #tpu.memory_space<vmem>>, vector<1x64x48xbf16>
      %49 = vector.shape_cast %48 : vector<1x64x48xbf16> to vector<64x48xbf16>
      %cst_28 = arith.constant dense<0.000000e+00> : vector<64x48xf32>
      %50 = tpu.matmul %28, %49, %cst_28 {dimension_numbers = #tpu.dot_dimension_numbers<[1], [0], [0], [1], [0, 0, 1, 1], [], []>} : vector<64x64xbf16>, vector<64x48xbf16>, vector<64x48xf32> -> vector<64x48xf32>
      %51 = vector.extract_strided_slice %50 {offsets = [0, 0], sizes = [64, 16], strides = [1, 1]} : vector<64x48xf32> to vector<64x16xf32>
      %52 = arith.mulf %51, %30 : vector<64x16xf32>
      %53 = vector.extract_strided_slice %51 {offsets = [0, 4], sizes = [64, 12], strides = [1, 1]} : vector<64x16xf32> to vector<64x12xf32>
      %54 = vector.extract_strided_slice %51 {offsets = [0, 0], sizes = [64, 4], strides = [1, 1]} : vector<64x16xf32> to vector<64x4xf32>
      %55 = tpu.concatenate %53, %54 in 1 : vector<64x12xf32>, vector<64x4xf32> -> vector<64x16xf32>
      %56 = arith.mulf %55, %32 : vector<64x16xf32>
      %57 = arith.addf %52, %56 : vector<64x16xf32>
      %58 = vector.extract_strided_slice %51 {offsets = [0, 12], sizes = [64, 4], strides = [1, 1]} : vector<64x16xf32> to vector<64x4xf32>
      %59 = vector.extract_strided_slice %51 {offsets = [0, 0], sizes = [64, 12], strides = [1, 1]} : vector<64x16xf32> to vector<64x12xf32>
      %60 = tpu.concatenate %58, %59 in 1 : vector<64x4xf32>, vector<64x12xf32> -> vector<64x16xf32>
      %61 = arith.mulf %60, %34 : vector<64x16xf32>
      %62 = arith.addf %57, %61 : vector<64x16xf32>
      %63 = arith.truncf %62 : vector<64x16xf32> to vector<64x16xbf16>
      %64 = vector.extract_strided_slice %50 {offsets = [0, 16], sizes = [64, 16], strides = [1, 1]} : vector<64x48xf32> to vector<64x16xf32>
      %65 = arith.mulf %64, %30 : vector<64x16xf32>
      %66 = vector.extract_strided_slice %64 {offsets = [0, 4], sizes = [64, 12], strides = [1, 1]} : vector<64x16xf32> to vector<64x12xf32>
      %67 = vector.extract_strided_slice %64 {offsets = [0, 0], sizes = [64, 4], strides = [1, 1]} : vector<64x16xf32> to vector<64x4xf32>
      %68 = tpu.concatenate %66, %67 in 1 : vector<64x12xf32>, vector<64x4xf32> -> vector<64x16xf32>
      %69 = arith.mulf %68, %32 : vector<64x16xf32>
      %70 = arith.addf %65, %69 : vector<64x16xf32>
      %71 = vector.extract_strided_slice %64 {offsets = [0, 12], sizes = [64, 4], strides = [1, 1]} : vector<64x16xf32> to vector<64x4xf32>
      %72 = vector.extract_strided_slice %64 {offsets = [0, 0], sizes = [64, 12], strides = [1, 1]} : vector<64x16xf32> to vector<64x12xf32>
      %73 = tpu.concatenate %71, %72 in 1 : vector<64x4xf32>, vector<64x12xf32> -> vector<64x16xf32>
      %74 = arith.mulf %73, %34 : vector<64x16xf32>
      %75 = arith.addf %70, %74 : vector<64x16xf32>
      %76 = arith.truncf %75 : vector<64x16xf32> to vector<64x16xbf16>
      %77 = vector.extract_strided_slice %50 {offsets = [0, 32], sizes = [64, 16], strides = [1, 1]} : vector<64x48xf32> to vector<64x16xf32>
      %78 = arith.truncf %77 : vector<64x16xf32> to vector<64x16xbf16>
      %cst_29 = arith.constant dense<0.000000e+00> : vector<64x64xf32>
      %79 = tpu.matmul %63, %76, %cst_29 {dimension_numbers = #tpu.dot_dimension_numbers<[1], [1], [0], [0], [0, 0, 1, 0], [], []>} : vector<64x16xbf16>, vector<64x16xbf16>, vector<64x64xf32> -> vector<64x64xf32>
      %cst_30 = arith.constant -1.000000e+30 : f32
      %80 = vector.broadcast %cst_30 : f32 to vector<64x64xf32>
      %81 = arith.select %39, %79, %80 : vector<64x64xi1>, vector<64x64xf32>
      %cst_31 = arith.constant dense<0xFF800000> : vector<64xf32>
      %82 = vector.multi_reduction <maximumf>, %81, %cst_31 [1] : vector<64x64xf32> to vector<64xf32>
      %83 = vector.shape_cast %82 : vector<64xf32> to vector<64x1xf32>
      %84 = vector.broadcast %83 : vector<64x1xf32> to vector<64x64xf32>
      %85 = arith.subf %81, %84 : vector<64x64xf32>
      %86 = math.exp %85 : vector<64x64xf32>
      %cst_32 = arith.constant dense<0.000000e+00> : vector<64xf32>
      %87 = vector.multi_reduction <add>, %86, %cst_32 [1] : vector<64x64xf32> to vector<64xf32>
      %88 = vector.shape_cast %87 : vector<64xf32> to vector<64x1xf32>
      %89 = arith.truncf %86 : vector<64x64xf32> to vector<64x64xbf16>
      %cst_33 = arith.constant dense<0.000000e+00> : vector<64x16xf32>
      %90 = tpu.matmul %89, %78, %cst_33 {dimension_numbers = #tpu.dot_dimension_numbers<[1], [0], [0], [1], [0, 0, 1, 1], [], []>} : vector<64x64xbf16>, vector<64x16xbf16>, vector<64x16xf32> -> vector<64x16xf32>
      %91 = tpu.reciprocal %88 {approx = true} : vector<64x1xf32> -> vector<64x1xf32>
      %92 = vector.broadcast %91 : vector<64x1xf32> to vector<64x16xf32>
      %93 = arith.mulf %90, %92 : vector<64x16xf32>
      %c0_34 = arith.constant 0 : index
      %c0_35 = arith.constant 0 : index
      %94 = vector.load %arg8[%c0_34, %c0_35] : memref<64x64xf32, #tpu.memory_space<vmem>>, vector<64x64xf32>
      %95 = arith.truncf %93 : vector<64x16xf32> to vector<64x16xbf16>
      %96 = arith.index_cast %arg9 : i32 to index
      %c0_36 = arith.constant 0 : index
      %c0_37 = arith.constant 0 : index
      %97 = vector.load %arg5[%96, %c0_36, %c0_37] : memref<4x16x64xbf16, #tpu.memory_space<vmem>>, vector<1x16x64xbf16>
      %98 = vector.shape_cast %97 : vector<1x16x64xbf16> to vector<16x64xbf16>
      %cst_38 = arith.constant dense<0.000000e+00> : vector<64x64xf32>
      %99 = tpu.matmul %95, %98, %cst_38 {dimension_numbers = #tpu.dot_dimension_numbers<[1], [0], [0], [1], [0, 0, 1, 1], [], []>} : vector<64x16xbf16>, vector<16x64xbf16>, vector<64x64xf32> -> vector<64x64xf32>
      %100 = arith.addf %94, %99 : vector<64x64xf32>
      %c0_39 = arith.constant 0 : index
      %c0_40 = arith.constant 0 : index
      %101 = vector.load %arg8[%c0_39, %c0_40] : memref<64x64xf32, #tpu.memory_space<vmem>>, vector<64x64xf32>
      tpu.vector_store %arg8[%c0_39, %c0_40], %100 {strides = array<i32>} : memref<64x64xf32, #tpu.memory_space<vmem>>, vector<64x64xf32>,
    }
    %c4_i32_20 = arith.constant 4 : i32
    %c0_21 = arith.constant 0 : index
    %c0_22 = arith.constant 0 : index
    %43 = vector.load %arg8[%c0_21, %c0_22] : memref<64x64xf32, #tpu.memory_space<vmem>>, vector<64x64xf32>
    %c0_23 = arith.constant 0 : index
    %c0_24 = arith.constant 0 : index
    %c0_25 = arith.constant 0 : index
    %44 = vector.load %arg7[%c0_23, %c0_24, %c0_25] : memref<1x64x64xf32, #tpu.memory_space<vmem>>, vector<1x64x64xf32>
    %45 = vector.shape_cast %44 : vector<1x64x64xf32> to vector<64x64xf32>
    %46 = vector.shape_cast %43 : vector<64x64xf32> to vector<1x64x64xf32>
    tpu.vector_store %arg7[%c0_23, %c0_24, %c0_25], %46 {strides = array<i32>} : memref<1x64x64xf32, #tpu.memory_space<vmem>>, vector<1x64x64xf32>,
    return
  }
  func.func @transform_0(%arg0: i32) -> (i32, i32, i32) {
    %c0_i32 = arith.constant 0 : i32
    %c0_i32_0 = arith.constant 0 : i32
    %c0_i32_1 = arith.constant 0 : i32
    return %arg0, %c0_i32, %c0_i32_0 : i32, i32, i32
  }
  func.func @transform_1(%arg0: i32) -> (i32, i32) {
    %c0_i32 = arith.constant 0 : i32
    %c0_i32_0 = arith.constant 0 : i32
    %c0_i32_1 = arith.constant 0 : i32
    return %c0_i32, %c0_i32_0 : i32, i32
  }
  func.func @transform_2(%arg0: i32) -> (i32, i32) {
    %c0_i32 = arith.constant 0 : i32
    %c0_i32_0 = arith.constant 0 : i32
    %c0_i32_1 = arith.constant 0 : i32
    return %c0_i32, %c0_i32_0 : i32, i32
  }
  func.func @transform_3(%arg0: i32) -> (i32, i32, i32) {
    %c0_i32 = arith.constant 0 : i32
    %c0_i32_0 = arith.constant 0 : i32
    %c0_i32_1 = arith.constant 0 : i32
    %c0_i32_2 = arith.constant 0 : i32
    return %c0_i32, %c0_i32_0, %c0_i32_1 : i32, i32, i32
  }
  func.func @transform_4(%arg0: i32) -> (i32, i32, i32) {
    %c0_i32 = arith.constant 0 : i32
    %c0_i32_0 = arith.constant 0 : i32
    %c0_i32_1 = arith.constant 0 : i32
    %c0_i32_2 = arith.constant 0 : i32
    return %c0_i32, %c0_i32_0, %c0_i32_1 : i32, i32, i32
  }
  func.func @transform_5(%arg0: i32) -> (i32, i32, i32) {
    %c0_i32 = arith.constant 0 : i32
    %c0_i32_0 = arith.constant 0 : i32
    %c0_i32_1 = arith.constant 0 : i32
    %c0_i32_2 = arith.constant 0 : i32
    return %c0_i32, %c0_i32_0, %c0_i32_1 : i32, i32, i32
  }
  func.func @transform_6(%arg0: i32) -> (i32, i32, i32) {
    %c0_i32 = arith.constant 0 : i32
    %c0_i32_0 = arith.constant 0 : i32
    %c0_i32_1 = arith.constant 0 : i32
    return %arg0, %c0_i32, %c0_i32_0 : i32, i32, i32
  }
}

</mosaic_0001>

<bundles_post_ra>
// kernel: tpu_custom_call.1
= control target key start
LH: loop header
LB: loop body
LE: loop exit
PB: predicated region body
PF: predicated region fallthrough
CT: control target
= control target key end

     0   :  { %11 = vsyncpa [#allocation4], 0  ;;  %s2587_s0 = inlined_call_operand.vmem [shape: f32[2,64,64], index: 0, kind: input, shape index: {}]   ;;  %s2588_s1 = inlined_call_operand.vmem [shape: f32[1,64], index: 1, kind: input, shape index: {}]   ;;  %s2589_s2 = inlined_call_operand.vmem [shape: f32[1,64], index: 2, kind: input, shape index: {}]   ;;  %s2590_s3 = inlined_call_operand.vmem [shape: bf16[4,64,48], index: 3, kind: input, shape index: {}]   ;;  %s2591_s4 = inlined_call_operand.vmem [shape: bf16[4,16,64], index: 4, kind: input, shape index: {}]   ;;  %s2592_s5 = inlined_call_operand.vmem [shape: f32[3,64,16], index: 5, kind: input, shape index: {}]   ;;  %s2593_s6 = inlined_call_operand.hbm [shape: f32[2,64,64], index: 6, kind: output, shape index: {}]  }
   0x1   :  { %13 = vsyncpa [#allocation4 + $0x1], 0  ;;  %s1695_s21 = smov 0   ;;  %s1697_s22 = smov 0  }
   0x2   :  { %s1699_s23 = smov 0   ;;  %s1701_s24 = smov 0  }
   0x3 LB: > { %s1716_s25 = sadd.s32 4294967295, %s1641_s24   ;;  %s1386_s26 = sadd.s32 4294967294, %s1641_s24   ;;  %s1641_s24 = sphi %s1701_s24, %s2678_s24   ;;  %s1637_s23 = sphi %s1699_s23, %s2677_s23   ;;  %s1633_s22 = sphi %s1697_s22, %s2676_s22   ;;  %s1629_s21 = sphi %s1695_s21, %s2675_s21  }
   0x4   : > { %s1720_s27 = sadd.s32 1, %s1641_s24   ;;  %s157_s28 = sadd.s32 1, %s1637_s23 }
   0x5   : > { %s154_s29 = ssub.s32 %s1641_s24, %s1720_s27  ;;  %p167_p0 = scmp.ne.s32.totalorder %s1637_s23, %s1633_s22 }
   0x6   : > { %p155_p1 = scmp.eq.s32.totalorder %s154_s29, 0  ;;  %p168_p2 = scmp.eq.s32.totalorder %s1716_s25, 1 }
   0x7   : > { %p173_p3 = scmp.ne.s32.totalorder %s1633_s22, %s1629_s21  ;;  %p174_p4 = scmp.eq.s32.totalorder %s1386_s26, 1 }
   0x8   : > { %s1731_s30 = scalar_select %p155_p1, %s1637_s23, %s157_s28  }
   0x9   : > { %p1733_p5 = por %p168_p2, %p167_p0  ;;  %p1737_p6 = por %p174_p4, %p173_p3 }
   0xa   : > { %p1389_p7 = scmp.ge.s32.totalorder %s1641_s24, 1  ;;  %p215_p8 = scmp.lt.s32.totalorder %s1641_s24, 3 }
   0xc   : > { %p216_p9 = pnand %p1389_p7, %p215_p8 }
   0xe   : > { %219 = sbr.rel (%p216_p9) target bundleno = 1531 (0x5fb), region = 44 }
  0x13   : > { %p245_p10 = scmp.lt.s32.totalorder %s1716_s25, 1  ;;  %vm259_vm0 = vcmask 523264   ;;  %v1647_v0 = vmov 0.0   ;;  %v1648_v17 = vmov 64.0   ;;  %s242_s14 = sand.u32 1, %s1633_s22  }
  0x14   : > { %516 = vst.msk [vmem:[#allocation2] sm:$0xff] %vm259_vm0, %v1647_v0  ;;  %1525 = vrcp.f32 %v1648_v17  ;;  %s1817_s15 = sshll.u32 %s242_s14, 6  ;;  %s2135_s17 = smov 0  }
  0x15   : > { %s246_s9 = scalar_select %p245_p10, %s1716_s25, 1  ;;  %517 = vst.msk [vmem:[#allocation2 + $0x8] sm:$0xff] %vm259_vm0, %v1647_v0 }
  0x16   : > { %518 = vst.msk [vmem:[#allocation2 + $0x10] sm:$0xff] %vm259_vm0, %v1647_v0  ;;  %s2133_s16 = scalar_lea.vmem [#allocation3], %s1817_s15 }
  0x17   : > { %s1454_s10 = sshll.u32 %s246_s9, 6  ;;  %519 = vst.msk [vmem:[#allocation2 + $0x18] sm:$0xff] %vm259_vm0, %v1647_v0 }
  0x18   : > { %s249_s13 = scalar_lea.vmem %s2587_s0, %s1454_s10  ;;  %520 = vst.msk [vmem:[#allocation2 + $0x20] sm:$0xff] %vm259_vm0, %v1647_v0 }
  0x19   : > { %v255_v1 = vld [vmem:[%s249_s13 + $0x20] sm:$0xff]  ;;  %521 = vst.msk [vmem:[#allocation2 + $0x28] sm:$0xff] %vm259_vm0, %v1647_v0  ;;  %v253_v2 = vld [vmem:[%s249_s13 + $0x10] sm:$0xff]  ;;  %v256_v7 = vld [vmem:[%s249_s13 + $0x28] sm:$0xff] }
  0x1a   : > { %v251_v3 = vld [vmem:[%s249_s13] sm:$0xff]  ;;  %v272_v4 = vsel %vm259_vm0, %v255_v1, 0.0  ;;  %522 = vst.msk [vmem:[#allocation2 + $0x30] sm:$0xff] %vm259_vm0, %v1647_v0  ;;  %v266_v5 = vsel %vm259_vm0, %v253_v2, 0.0  ;;  %v254_v8 = vld [vmem:[%s249_s13 + $0x18] sm:$0xff]  ;;  %v252_v9 = vld [vmem:[%s249_s13 + $0x8] sm:$0xff]  ;;  %v1526_v18 = vpop.eup %1525 }
  0x1b   : > { %v260_v6 = vsel %vm259_vm0, %v251_v3, 0.0  ;;  %523 = vst.msk [vmem:[#allocation2 + $0x38] sm:$0xff] %vm259_vm0, %v1647_v0  ;;  %273 = vadd.xlane.f32.xlu2 %v272_v4  ;;  %267 = vadd.xlane.f32.xlu1 %v266_v5  ;;  %v275_v10 = vsel %vm259_vm0, %v256_v7, 0.0  ;;  %v269_v11 = vsel %vm259_vm0, %v254_v8, 0.0  ;;  %v263_v12 = vsel %vm259_vm0, %v252_v9, 0.0  ;;  %v258_v13 = vld [vmem:[%s249_s13 + $0x38] sm:$0xff] }
  0x1c   : > { %261 = vadd.xlane.f32.xlu0 %v260_v6  ;;  %v257_v14 = vld [vmem:[%s249_s13 + $0x30] sm:$0xff]  ;;  %v281_v15 = vsel %vm259_vm0, %v258_v13, 0.0  ;;  %v285_v19 = vmul.f32 64.0, %v1526_v18  ;;  %vm289_vm1 = vweird.f32 %v1526_v18 }
  0x1d   : > { %v278_v16 = vsel %vm259_vm0, %v257_v14, 0.0 }
  0x1e   : > { %v286_v20 = vsub.f32 1.0, %v285_v19 }
  0x20   : > { %v287_v21 = vmul.f32 %v1526_v18, %v286_v20 }
  0x22   : > { %v288_v22 = vadd.f32 %v1526_v18, %v287_v21 }
  0x23   : > { %276 = vadd.xlane.f32.xlu2 %v275_v10  ;;  %270 = vadd.xlane.f32.xlu1 %v269_v11 }
  0x24   : > { %264 = vadd.xlane.f32.xlu0 %v263_v12  ;;  %v1764_v23 = vsel %vm289_vm1, %v1526_v18, %v288_v22 }
  0x2b   : > { %282 = vadd.xlane.f32.xlu1 %v281_v15 }
  0x2c   : > { %279 = vadd.xlane.f32.xlu0 %v278_v16 }
  0x8e   : > { %v274_v24 = vpop.xlane.xlu2 %273  ;;  %v268_v25 = vpop.xlane.xlu1 %267 }
  0x8f   : > { %v293_v26 = vmul.f32 %v1764_v23, %v268_v25  ;;  %v262_v27 = vpop.xlane.xlu0 %261  ;;  %v295_v40 = vmul.f32 %v1764_v23, %v274_v24 }
  0x90   : > { %v291_v28 = vmul.f32 %v1764_v23, %v262_v27 }
  0x91   : > { %v1768_v29 = vsub.f32 %v253_v2, %v293_v26  ;;  %v1792_v47 = vsub.f32 %v255_v1, %v295_v40 }
  0x92   : > { %v1770_v30 = vsub.f32 %v251_v3, %v291_v28 }
  0x93   : > { %v309_v31 = vmul.f32 %v1768_v29, %v1768_v29  ;;  %v311_v56 = vmul.f32 %v1792_v47, %v1792_v47 }
  0x94   : > { %v307_v32 = vmul.f32 %v1770_v30, %v1770_v30 }
  0x95   : > { %v321_v33 = vsel %vm259_vm0, %v309_v31, 0.0  ;;  %v327_v59 = vsel %vm259_vm0, %v311_v56, 0.0  ;;  %v1886_v56 = vld [vmem:[%s2589_s2] ss:$0 sm:$0xff] }
  0x96   : > { %v277_v34 = vpop.xlane.xlu2 %276  ;;  %322 = vadd.xlane.f32.xlu1 %v321_v33  ;;  %v271_v35 = vpop.xlane.xlu1 %270  ;;  %v315_v36 = vsel %vm259_vm0, %v307_v32, 0.0 }
  0x97   : > { %v296_v37 = vmul.f32 %v1764_v23, %v277_v34  ;;  %v294_v38 = vmul.f32 %v1764_v23, %v271_v35  ;;  %316 = vadd.xlane.f32.xlu2 %v315_v36  ;;  %v265_v39 = vpop.xlane.xlu0 %264 }
  0x98   : > { %v292_v41 = vmul.f32 %v1764_v23, %v265_v39  ;;  %v2002_v39 = vld [vmem:[%s2592_s5 + $0xa0] sm:$0xff] }
  0x99   : > { %v1782_v42 = vsub.f32 %v256_v7, %v296_v37  ;;  %v1784_v43 = vsub.f32 %v254_v8, %v294_v38 }
  0x9a   : > { %v1786_v44 = vsub.f32 %v252_v9, %v292_v41 }
  0x9b   : > { %v312_v45 = vmul.f32 %v1782_v42, %v1782_v42  ;;  %v310_v46 = vmul.f32 %v1784_v43, %v1784_v43 }
  0x9c   : > { %v308_v48 = vmul.f32 %v1786_v44, %v1786_v44 }
  0x9d   : > { %v330_v49 = vsel %vm259_vm0, %v312_v45, 0.0  ;;  %v324_v50 = vsel %vm259_vm0, %v310_v46, 0.0  ;;  %v1853_v45 = vld [vmem:[%s2588_s1] ss:$0 sm:$0xff] }
  0x9e   : > { %331 = vadd.xlane.f32.xlu1 %v330_v49  ;;  %v318_v51 = vsel %vm259_vm0, %v308_v48, 0.0  ;;  %v283_v52 = vpop.xlane.xlu1 %282 }
  0x9f   : > { %325 = vadd.xlane.f32.xlu2 %v324_v50  ;;  %319 = vadd.xlane.f32.xlu0 %v318_v51  ;;  %v280_v53 = vpop.xlane.xlu0 %279  ;;  %v298_v55 = vmul.f32 %v1764_v23, %v283_v52 }
  0xa0   : > { %v297_v54 = vmul.f32 %v1764_v23, %v280_v53 }
  0xa1   : > { %v1805_v58 = vsub.f32 %v258_v13, %v298_v55  ;;  %v1876_v55 = vld [vmem:[%s2592_s5] sm:$0xff] }
  0xa2   : > { %v1803_v57 = vsub.f32 %v257_v14, %v297_v54 }
  0xa3   : > { %v314_v62 = vmul.f32 %v1805_v58, %v1805_v58 }
  0xa4   : > { %v313_v60 = vmul.f32 %v1803_v57, %v1803_v57 }
  0xa5   : > { %v336_v63 = vsel %vm259_vm0, %v314_v62, 0.0  ;;  %v1893_v62 = vld [vmem:[%s2592_s5 + $0x10] sm:$0xff] }
  0xa6   : > { %v333_v61 = vsel %vm259_vm0, %v313_v60, 0.0 }
  0xa7   : > { %328 = vadd.xlane.f32.xlu0 %v327_v59  ;;  %334 = vadd.xlane.f32.xlu2 %v333_v61 }
  0xaf   : > { %337 = vadd.xlane.f32.xlu0 %v336_v63  ;;  %v1898_v63 = vld [vmem:[%s2592_s5 + $0x18] sm:$0xff] }
 0x109   : > { %v323_v0 = vpop.xlane.xlu1 %322 }
 0x10a   : > { %v341_v1 = vmul.f32 %v323_v0, %v1764_v23  ;;  %v317_v2 = vpop.xlane.xlu2 %316  ;;  %v1903_v0 = vld [vmem:[%s2592_s5 + $0x20] sm:$0xff] }
 0x10b   : > { %v339_v3 = vmul.f32 %v317_v2, %v1764_v23  ;;  %v1909_v2 = vld [vmem:[%s2592_s5 + $0x28] sm:$0xff] }
 0x10c   : > { %v349_v4 = vadd.f32 1e-05, %v341_v1 }
 0x10d   : > { %v347_v5 = vadd.f32 1e-05, %v339_v3  ;;  %v1914_v3 = vld [vmem:[%s2592_s5 + $0x30] sm:$0xff] }
 0x10e   : > { %1527 = vrsqrt.f32 %v349_v4  ;;  %vm381_vm2 = vweird.f32 %v349_v4  ;;  %2621 = vst [vmem:[#allocation6_spill] sm:$0xff] %v1914_v3 }
 0x10f   : > { %1529 = vrsqrt.f32 %v347_v5  ;;  %vm361_vm5 = vweird.f32 %v347_v5 }
 0x111   : > { %v332_v6 = vpop.xlane.xlu1 %331 }
 0x112   : > { %v344_v7 = vmul.f32 %v332_v6, %v1764_v23  ;;  %v326_v8 = vpop.xlane.xlu2 %325  ;;  %v320_v9 = vpop.xlane.xlu0 %319 }
 0x113   : > { %v342_v10 = vmul.f32 %v326_v8, %v1764_v23  ;;  %v340_v11 = vmul.f32 %v320_v9, %v1764_v23  ;;  %v1926_v9 = vld [vmem:[%s2592_s5 + $0x40] sm:$0xff] }
 0x114   : > { %v1528_v12 = vpop.eup %1527  ;;  %v352_v13 = vadd.f32 1e-05, %v344_v7 }
 0x115   : > { %v1530_v14 = vpop.eup %1529  ;;  %v376_v15 = vmul.f32 %v1528_v12, %v349_v4  ;;  %v350_v16 = vadd.f32 1e-05, %v342_v10  ;;  %v1824_v17 = vadd.f32 1e-05, %v340_v11  ;;  %vm382_vm3 = vweird.f32 %v1528_v12  ;;  %v1919_v4 = vld [vmem:[%s2592_s5 + $0x38] sm:$0xff]  ;;  %v1931_v10 = vld [vmem:[%s2592_s5 + $0x48] sm:$0xff] }
 0x116   : > { %v356_v18 = vmul.f32 %v1530_v14, %v347_v5  ;;  %1531 = vrsqrt.f32 %v352_v13  ;;  %vm362_vm4 = vweird.f32 %v1530_v14  ;;  %vm411_vm6 = vweird.f32 %v352_v13  ;;  %vm383_vm8 = vmor %vm381_vm2, %vm382_vm3  ;;  %v1936_v11 = vld [vmem:[%s2592_s5 + $0x50] sm:$0xff] }
 0x117   : > { %v377_v19 = vmul.f32 %v1528_v12, %v376_v15  ;;  %1533 = vrsqrt.f32 %v350_v16  ;;  %vm391_vm7 = vweird.f32 %v350_v16  ;;  %vm1842_vm10 = vmor %vm361_vm5, %vm362_vm4  ;;  %v1952_v15 = vld [vmem:[%s2592_s5 + $0x68] sm:$0xff]  ;;  %vm371_vm15 = vweird.f32 %v1824_v17 }
 0x118   : > { %v357_v20 = vmul.f32 %v1530_v14, %v356_v18  ;;  %1535 = vrsqrt.f32 %v1824_v17 }
 0x119   : > { %v378_v21 = vmul.f32 0.5, %v377_v19 }
 0x11a   : > { %v358_v22 = vmul.f32 0.5, %v357_v20  ;;  %v335_v24 = vpop.xlane.xlu2 %334  ;;  %v329_v25 = vpop.xlane.xlu0 %328  ;;  %v1960_v20 = vld [vmem:[%s2592_s5 + $0x70] sm:$0xff] }
 0x11b   : > { %v379_v26 = vsub.f32 1.5, %v378_v21  ;;  %v345_v27 = vmul.f32 %v335_v24, %v1764_v23  ;;  %v343_v28 = vmul.f32 %v329_v25, %v1764_v23  ;;  %2622 = vst [vmem:[#allocation7_spill] sm:$0xff] %v1960_v20  ;;  %v1965_v21 = vld [vmem:[%s2592_s5 + $0x78] sm:$0xff] }
 0x11c   : > { %v1829_v31 = vpop.eup %1531  ;;  %v359_v32 = vsub.f32 1.5, %v358_v22  ;;  %v1970_v22 = vld [vmem:[%s2592_s5 + $0x80] sm:$0xff] }
 0x11d   : > { %v1831_v33 = vpop.eup %1533  ;;  %v380_v34 = vmul.f32 %v1528_v12, %v379_v26  ;;  %v406_v35 = vmul.f32 %v1829_v31, %v352_v13  ;;  %vm412_vm9 = vweird.f32 %v1829_v31  ;;  %v1837_v36 = vadd.f32 1e-05, %v345_v27  ;;  %v1981_v27 = vld [vmem:[%s2592_s5 + $0x88] sm:$0xff] }
 0x11e   : > { %v1839_v37 = vpop.eup %1535  ;;  %v360_v38 = vmul.f32 %v1530_v14, %v359_v32  ;;  %v386_v40 = vmul.f32 %v1831_v33, %v350_v16  ;;  %vm392_vm11 = vweird.f32 %v1831_v33  ;;  %v1848_v41 = vadd.f32 1e-05, %v343_v28  ;;  %vm1857_vm12 = vmor %vm411_vm6, %vm412_vm9  ;;  %v1986_v28 = vld [vmem:[%s2592_s5 + $0x90] sm:$0xff]  ;;  %v1991_v32 = vld [vmem:[%s2592_s5 + $0x98] sm:$0xff] }
 0x11f   : > { %v384_v46 = vsel %vm383_vm8, %v1528_v12, %v380_v34  ;;  %v407_v48 = vmul.f32 %v1829_v31, %v406_v35  ;;  %v366_v50 = vmul.f32 %v1839_v37, %v1824_v17  ;;  %vm1868_vm13 = vmor %vm391_vm7, %vm392_vm11  ;;  %1537 = vrsqrt.f32 %v1837_v36 }
 0x120   : > { %v437_v51 = vmul.f32 %v384_v46, %v1768_v29  ;;  %v364_v52 = vsel %vm1842_vm10, %v1530_v14, %v360_v38  ;;  %v387_v53 = vmul.f32 %v1831_v33, %v386_v40  ;;  %v1881_v29 = vld [vmem:[%s2592_s5 + $0x8] sm:$0xff]  ;;  %1539 = vrsqrt.f32 %v1848_v41  ;;  %v1947_v14 = vld [vmem:[%s2592_s5 + $0x60] sm:$0xff]  ;;  %v2012_v46 = vld [vmem:[%s2592_s5 + $0xb0] sm:$0xff] }
 0x121   : > { %v435_v59 = vmul.f32 %v364_v52, %v1770_v30  ;;  %v408_v60 = vmul.f32 0.5, %v407_v48  ;;  %v367_v61 = vmul.f32 %v1839_v37, %v366_v50  ;;  %v497_v16 = vlaneseq  ;;  %v2007_v40 = vld [vmem:[%s2592_s5 + $0xa8] sm:$0xff]  ;;  %2624 = vst [vmem:[#allocation9_spill] sm:$0xff] %v2012_v46 }
 0x122   : > { %v388_v1 = vmul.f32 0.5, %v387_v53  ;;  %v338_v30 = vpop.xlane.xlu0 %337  ;;  %v449_v5 = vmul.f32 %v1853_v45, %v437_v51  ;;  %vm372_vm14 = vweird.f32 %v1839_v37  ;;  %vm421_vm1 = vweird.f32 %v1837_v36  ;;  %v2030_v53 = vld [vmem:[%s2592_s5 + $0xb8] sm:$0xff] }
 0x123   : > { %v409_v6 = vsub.f32 1.5, %v408_v60  ;;  %v368_v7 = vmul.f32 0.5, %v367_v61  ;;  %v346_v8 = vmul.f32 %v338_v30, %v1764_v23  ;;  %v447_v12 = vmul.f32 %v1853_v45, %v435_v59  ;;  %v1942_v23 = vld [vmem:[%s2592_s5 + $0x58] sm:$0xff]  ;;  %vm373_vm2 = vmor %vm371_vm15, %vm372_vm14  ;;  %2627 = vst [vmem:[#allocation12_spill] sm:$0xff] %v2030_v53 }
 0x124   : > { %v389_v13 = vsub.f32 1.5, %v388_v1  ;;  %v1994_v34 = vadd.f32 %v1886_v56, %v449_v5  ;;  %v2014_v48 = vshrl.u32 %v497_v16, 7  ;;  %v2032_v59 = vand.u32 127, %v497_v16 }
 0x125   : > { %v369_v18 = vsub.f32 1.5, %v368_v7  ;;  %v1955_v19 = vadd.f32 1e-05, %v346_v8  ;;  %v1972_v24 = vpop.eup %1537  ;;  %v410_v25 = vmul.f32 %v1829_v31, %v409_v6  ;;  %v2017_v51 = vadd.f32 %v1886_v56, %v447_v12 }
 0x126   : > { %v390_v26 = vmul.f32 %v1831_v33, %v389_v13  ;;  %2623 = vst [vmem:[#allocation8_spill] sm:$0xff] %v1994_v34  ;;  %v416_v38 = vmul.f32 %v1972_v24, %v1837_v36  ;;  %v1540_v50 = vpop.eup %1539  ;;  %vm422_vm3 = vweird.f32 %v1972_v24  ;;  %v2049_v7 = vadd.s32 16, %v2014_v48 }
 0x127   : > { %v370_v35 = vmul.f32 %v1839_v37, %v369_v18  ;;  %2625 = vst [vmem:[#allocation10_spill] sm:$0xff] %v2014_v48  ;;  %1541 = vrsqrt.f32 %v1955_v19  ;;  %v396_v54 = vmul.f32 %v1540_v50, %v1848_v41  ;;  %v414_v17 = vsel %vm1857_vm12, %v1829_v31, %v410_v25  ;;  %vm2089_vm8 = vmor %vm421_vm1, %vm422_vm3 }
 0x128   : > { %2626 = vst [vmem:[#allocation11_spill] sm:$0xff] %v2017_v51  ;;  %v394_v52 = vsel %vm1868_vm13, %v1831_v33, %v390_v26  ;;  %v417_v33 = vmul.f32 %v1972_v24, %v416_v38  ;;  %vm402_vm4 = vweird.f32 %v1540_v50  ;;  %v2052_v49 = vadd.s32 24, %v2014_v48 }
 0x129   : > { %2628 = vst [vmem:[#allocation13_spill] sm:$0xff] %v2032_v59  ;;  %v438_v60 = vmul.f32 %v394_v52, %v1784_v43  ;;  %v374_v61 = vsel %vm373_vm2, %v1839_v37, %v370_v35  ;;  %v397_v6 = vmul.f32 %v1540_v50, %v396_v54  ;;  %v2045_v43 = vadd.s32 8, %v2014_v48 }
 0x12a   : > { %v436_v1 = vmul.f32 %v374_v61, %v1786_v44  ;;  %v418_v5 = vmul.f32 0.5, %v417_v33  ;;  %2630 = vst [vmem:[#allocation15_spill] sm:$0xff] %v2049_v7  ;;  %v2055_v44 = vadd.s32 32, %v2014_v48  ;;  %v2061_v13 = vadd.s32 40, %v2014_v48 }
 0x12b   : > { %v450_v30 = vmul.f32 %v1853_v45, %v438_v60  ;;  %2629 = vst [vmem:[#allocation14_spill] sm:$0xff] %v2045_v43  ;;  %v398_v12 = vmul.f32 0.5, %v397_v6  ;;  %v2067_v25 = vadd.s32 48, %v2014_v48  ;;  %v2070_v26 = vadd.s32 56, %v2014_v48 }
 0x12c   : > { %v448_v37 = vmul.f32 %v1853_v45, %v436_v1  ;;  %2631 = vst [vmem:[#allocation16_spill] sm:$0xff] %v2052_v49  ;;  %v419_v8 = vsub.f32 1.5, %v418_v5  ;;  %vm508_vm5 = vcmp.le.s32.totalorder %v2032_v59, %v2014_v48  ;;  %v440_v61 = vmul.f32 %v414_v17, %v1782_v42 }
 0x12d   : > { %2632 = vst [vmem:[#allocation17_spill] sm:$0xff] %v2055_v44  ;;  %v2058_v31 = vadd.f32 %v1886_v56, %v450_v30  ;;  %v1542_v16 = vpop.eup %1541  ;;  %v399_v52 = vsub.f32 1.5, %v398_v12  ;;  %vm509_vm6 = vcmp.le.s32.totalorder %v2032_v59, %v2045_v43  ;;  %vm510_vm7 = vcmp.le.s32.totalorder %v2032_v59, %v2049_v7 }
 0x12e   : > { %2634 = vst [vmem:[#allocation19_spill] sm:$0xff] %v2061_v13  ;;  %v2064_v18 = vadd.f32 %v1886_v56, %v448_v37  ;;  %v420_v38 = vmul.f32 %v1972_v24, %v419_v8  ;;  %v426_v60 = vmul.f32 %v1542_v16, %v1955_v19  ;;  %vm401_vm9 = vweird.f32 %v1848_v41 }
 0x12f   : > { %2633 = vst [vmem:[#allocation18_spill] sm:$0xff] %v2058_v31  ;;  %v400_v1 = vmul.f32 %v1540_v50, %v399_v52  ;;  %vm511_vm10 = vcmp.le.s32.totalorder %v2032_v59, %v2052_v49  ;;  %vm403_vm11 = vmor %vm401_vm9, %vm402_vm4  ;;  %vm512_vm12 = vcmp.le.s32.totalorder %v2032_v59, %v2055_v44  ;;  %vm513_vm13 = vcmp.le.s32.totalorder %v2032_v59, %v2061_v13 }
 0x130   : > { %2635 = vst [vmem:[#allocation20_spill] sm:$0xff] %v2064_v18  ;;  %v427_v42 = vmul.f32 %v1542_v16, %v426_v60  ;;  %vm514_vm14 = vcmp.le.s32.totalorder %v2032_v59, %v2067_v25  ;;  %v424_v36 = vsel %vm2089_vm8, %v1972_v24, %v420_v38  ;;  %vm515_vm15 = vcmp.le.s32.totalorder %v2032_v59, %v2070_v26 }
 0x131   : > { %2636 = vst [vmem:[#allocation21_spill] sm:$0xff] %v2067_v25  ;;  %v404_v41 = vsel %vm403_vm11, %v1540_v50, %v400_v1  ;;  %v452_v30 = vmul.f32 %v1853_v45, %v440_v61  ;;  %vm432_vm1 = vweird.f32 %v1542_v16  ;;  %v441_v37 = vmul.f32 %v424_v36, %v1803_v57 }
 0x132   : > { %2637 = vst [vmem:[#allocation22_spill] sm:$0xff] %v2070_v26  ;;  %v428_v17 = vmul.f32 0.5, %v427_v42  ;;  %v439_v5 = vmul.f32 %v404_v41, %v1792_v47  ;;  %vm431_vm2 = vweird.f32 %v1955_v19 }
 0x133   : > { %v2114_v24 = vadd.f32 %v1886_v56, %v452_v30  ;;  %vm433_vm3 = vmor %vm431_vm2, %vm432_vm1  ;;  %v453_v47 = vmul.f32 %v1853_v45, %v441_v37 }
 0x134   : > { %v429_v6 = vsub.f32 1.5, %v428_v17  ;;  %v451_v8 = vmul.f32 %v1853_v45, %v439_v5 }
 0x135   : > { %2640 = vst [vmem:[#allocation23_spill] sm:$0xff] %v2114_v24  ;;  %v2125_v61 = vadd.f32 %v1886_v56, %v453_v47 }
 0x136   : > { %v430_v12 = vmul.f32 %v1542_v16, %v429_v6  ;;  %v2117_v50 = vadd.f32 %v1886_v56, %v451_v8 }
 0x137   : > { %2642 = vst [vmem:[#allocation25_spill] sm:$0xff] %v2125_v61 }
 0x138   : > { %2641 = vst [vmem:[#allocation24_spill] sm:$0xff] %v2117_v50  ;;  %v434_v38 = vsel %vm433_vm3, %v1542_v16, %v430_v12 }
 0x139   : > { %v442_v57 = vmul.f32 %v434_v38, %v1805_v58 }
 0x13b   : > { %v454_v60 = vmul.f32 %v1853_v45, %v442_v57 }
 0x13d   : > { %v2128_v19 = vadd.f32 %v1886_v56, %v454_v60 }
 0x13f   : > { %2643 = vst [vmem:[#allocation26_spill] sm:$0xff] %v2128_v19 }
 0x140 LB: >> { %s1455_s18 = sshll.u32 %s1645_s17, 5  ;;  %v2644_v18 = vld [vmem:[#allocation20_spill] sm:$0xff]  ;;  %v2645_v51 = vld [vmem:[#allocation11_spill] sm:$0xff]  ;;  %v2647_v31 = vld [vmem:[#allocation18_spill] sm:$0xff]  ;;  %s1649_s15 = smov 116   ;;  %vm670_vm4 = vcmask 97280   ;;  %s1645_s17 = sphi %s2135_s17, %s529_s17  }
 0x141   : >> { %s532_s26 = scalar_lea.vmem %s2590_s3, %s1455_s18  ;;  %v2646_v33 = vpack.c.bf16 %v2644_v18, %v2645_v51  ;;  %v2648_v34 = vld [vmem:[#allocation8_spill] sm:$0xff]  ;;  %v2650_v24 = vld [vmem:[#allocation23_spill] sm:$0xff]  ;;  %v2654_v61 = vld [vmem:[#allocation25_spill] sm:$0xff]  ;;  %s1650_s28 = smov 108   ;;  %vm743_vm8 = vcmask 31744   ;;  %vm992_vm9 = vcmask 130048  }
 0x142   : >> { %v1459_v58 = vld [vmem:[%s532_s26 + $0x18] sm:$0xff]  ;;  %v1458_v45 = vld [vmem:[%s532_s26 + $0x10] sm:$0xff]  ;;  %v1457_v56 = vld [vmem:[%s532_s26 + $0x8] sm:$0xff]  ;;  %v2649_v35 = vpack.c.bf16 %v2647_v31, %v2648_v34  ;;  %s1651_s29 = smov 124   ;;  %s1652_s9 = smov 100  }
 0x143   : >> { %581 = vmatpush.bf16.msra.mxu0 %v1459_v58  ;;  %v1456_v16 = vld [vmem:[%s532_s26] sm:$0xff]  ;;  %v2651_v50 = vld [vmem:[#allocation24_spill] sm:$0xff]  ;;  %s1653_s10 = smov 16   ;;  %v2657_v20 = vld [vmem:[#allocation7_spill] sm:$0xff]  ;;  %s1654_s11 = smov 112  }
 0x144   : >> { %v2652_v52 = vpack.c.bf16 %v2650_v24, %v2651_v50  ;;  %v2656_v3 = vld [vmem:[#allocation6_spill] sm:$0xff]  ;;  %v2658_v46 = vld [vmem:[#allocation9_spill] sm:$0xff]  ;;  %v2660_v53 = vld [vmem:[#allocation12_spill] sm:$0xff]  ;;  %s1655_s12 = smov 12   ;;  %s1656_s13 = smov 4  }
 0x145   : >> { %s1657_s18 = smov 96   ;;  %s1460_s19 = sshll.u32 %s1645_s17, 3 }
 0x146   : >> { %v2653_v19 = vld [vmem:[#allocation26_spill] sm:$0xff]  ;;  %s529_s17 = sadd.s32 1, %s1645_s17  }
 0x147   : >> { %582 = vmatpush.bf16.msra.mxu0 %v1458_v45  ;;  %v2655_v54 = vpack.c.bf16 %v2653_v19, %v2654_v61  ;;  %p526_p11 = scmp.ge.s32.totalorder %s529_s17, 4  }
 0x148   : > { %s1595_s20 = scalar_lea.hbm (%p526_p11), %s2593_s6, 128 }
 0x14b   : >> { %583 = vmatpush.bf16.msra.mxu0 %v1457_v56 }
 0x14f   : >> { %584 = vmatpush.bf16.msra.mxu0 %v1456_v16 }
 0x152   : >> { %1427 = vmatmul.msk.bf16.vlgmr.msra.gmra.mxu0 %vm259_vm0, %v2646_v33 }
 0x162   : >> { %1428 = vmatmul.msk.bf16.gmra.mxu0 %vm259_vm0, %v2649_v35 }
 0x172   : >> { %1429 = vmatmul.msk.bf16.gmra.mxu0 %vm259_vm0, %v2652_v52 }
 0x182   : >> { %1430 = vmatmul.msk.bf16.gmra.mxu0 %vm259_vm0, %v2655_v54 }
 0x1cf   : >> { %v2160_v1 = vpop.f32.mrf.mxu0 }
 0x1d0   : >> { %695 = vrot.lane.b32.xlu1 %v2160_v1, %s1649_s15  ;;  %812 = vrot.lane.b32.xlu2 %v2160_v1, %s1650_s28 }
 0x1d1   : >> { %622 = vrot.lane.b32.xlu0 %v2160_v1, %s1651_s29 }
 0x1d7   : >> { %v2168_v42 = vpop.f32.mrf.mxu0 }
 0x1d8   : >> { %697 = vrot.lane.b32.xlu2 %v2168_v42, %s1649_s15  ;;  %624 = vrot.lane.b32.xlu1 %v2168_v42, %s1651_s29 }
 0x1d9   : >> { %814 = vrot.lane.b32.xlu0 %v2168_v42, %s1650_s28 }
 0x1df   : >> { %v2176_v36 = vpop.f32.mrf.mxu0 }
 0x1e0   : >> { %699 = vrot.lane.b32.xlu2 %v2176_v36, %s1649_s15  ;;  %626 = vrot.lane.b32.xlu1 %v2176_v36, %s1651_s29 }
 0x1e1   : >> { %816 = vrot.lane.b32.xlu0 %v2176_v36, %s1650_s28 }
 0x1e7   : >> { %v2184_v41 = vpop.f32.mrf.mxu0 }
 0x1e8   : >> { %896 = vrot.lane.b32.xlu1 %v2176_v36, %s1652_s9  ;;  %628 = vrot.lane.b32.xlu2 %v2184_v41, %s1651_s29 }
 0x1e9   : >> { %701 = vrot.lane.b32.xlu0 %v2184_v41, %s1649_s15 }
 0x1ef   : >> { %v2191_v17 = vpop.f32.mrf.mxu0 }
 0x1f0   : >> { %818 = vrot.lane.b32.xlu1 %v2184_v41, %s1650_s28  ;;  %898 = vrot.lane.b32.xlu2 %v2184_v41, %s1652_s9 }
 0x1f1   : >> { %703 = vrot.lane.b32.xlu0 %v2191_v17, %s1649_s15 }
 0x1f7   : >> { %v2198_v30 = vpop.f32.mrf.mxu0 }
 0x1f8   : >> { %820 = vrot.lane.b32.xlu1 %v2191_v17, %s1650_s28  ;;  %630 = vrot.lane.b32.xlu2 %v2191_v17, %s1651_s29 }
 0x1f9   : >> { %632 = vrot.lane.b32.xlu0 %v2198_v30, %s1651_s29 }
 0x1ff   : >> { %v2210_v5 = vpop.f32.mrf.mxu0 }
 0x200   : >> { %900 = vrot.lane.b32.xlu2 %v2191_v17, %s1652_s9  ;;  %705 = vrot.lane.b32.xlu1 %v2198_v30, %s1649_s15 }
 0x201   : >> { %902 = vrot.lane.b32.xlu0 %v2198_v30, %s1652_s9 }
 0x207   : >> { %v2218_v6 = vpop.f32.mrf.mxu0 }
 0x208   : >> { %822 = vrot.lane.b32.xlu2 %v2198_v30, %s1650_s28  ;;  %824 = vrot.lane.b32.xlu1 %v2210_v5, %s1650_s28 }
 0x209   : >> { %634 = vrot.lane.b32.xlu0 %v2210_v5, %s1651_s29 }
 0x210   : >> { %707 = vrot.lane.b32.xlu2 %v2210_v5, %s1649_s15  ;;  %826 = vrot.lane.b32.xlu1 %v2218_v6, %s1650_s28  ;;  %s1462_s28 = sshll.u32 (%p526_p11), %s1716_s25, 6  ;;  %s1300_s25 = scalar_lea.sflag (%p526_p11), [#allocation4], %s242_s14 }
 0x211   : >> { %904 = vrot.lane.b32.xlu0 %v2210_v5, %s1652_s9  ;;  %s1311_s17 = scalar_lea.hbm (%p526_p11), %s2593_s6, %s1462_s28 }
 0x218   : >> { %709 = vrot.lane.b32.xlu2 %v2218_v6, %s1649_s15  ;;  %906 = vrot.lane.b32.xlu1 %v2218_v6, %s1652_s9  ;;  %s1217_s15 = scalar_lea.vmem %s2591_s4, %s1460_s19 }
 0x219   : >> { %636 = vrot.lane.b32.xlu0 %v2218_v6, %s1651_s29 }
 0x220   : >> { %792 = vrot.lane.b32.xlu2 %v2656_v3, %s1653_s10  ;;  %894 = vrot.lane.b32.xlu1 %v2168_v42, %s1652_s9 }
 0x221   : >> { %892 = vrot.lane.b32.xlu0 %v2160_v1, %s1652_s9 }
 0x228   : >> { %788 = vrot.lane.b32.xlu2 %v1903_v0, %s1653_s10 }
 0x229   : >> { %794 = vrot.lane.b32.xlu0 %v1919_v4, %s1653_s10 }
 0x22a   : >> { %v2238_v37 = vpop.permute.xlu2 %812 }
 0x230   : >> { %784 = vrot.lane.b32.xlu2 %v1893_v62, %s1653_s10 }
 0x231   : >> { %790 = vrot.lane.b32.xlu0 %v1909_v2, %s1653_s10 }
 0x232   : >> { %v2244_v8 = vpop.permute.xlu2 %697 }
 0x239   : >> { %786 = vrot.lane.b32.xlu0 %v1898_v63, %s1653_s10 }
 0x23a   : >> { %v2248_v12 = vpop.permute.xlu2 %699 }
 0x242   : >> { %v2250_v38 = vpop.permute.xlu1 %695  ;;  %v2254_v57 = vpop.permute.xlu2 %628 }
 0x243   : >> { %v2252_v47 = vpop.permute.xlu0 %622 }
 0x24a   : >> { %v2256_v60 = vpop.permute.xlu1 %624  ;;  %v899_v45 = vpop.permute.xlu2 %898 }
 0x24b   : >> { %v2258_v58 = vpop.permute.xlu0 %814 }
 0x252   : >> { %v2260_v56 = vpop.permute.xlu1 %626  ;;  %v2265_v52 = vpop.permute.xlu2 %630 }
 0x253   : >> { %v817_v16 = vpop.permute.xlu0 %816 }
 0x254   : >> { %v838_v33 = vsel %vm670_vm4, %v817_v16, %v2260_v56 }
 0x255   : >> { %v846_v35 = vmul.f32 %v1936_v11, %v838_v33 }
 0x257   : >> { %864 = vrot.lane.b32.xlu1 %v846_v35, %s1653_s10 }
 0x25a   : >> { %v897_v54 = vpop.permute.xlu1 %896  ;;  %v901_v19 = vpop.permute.xlu2 %900 }
 0x25b   : >> { %v2268_v18 = vpop.permute.xlu0 %701 }
 0x262   : >> { %v819_v24 = vpop.permute.xlu1 %818  ;;  %v823_v16 = vpop.permute.xlu2 %822 }
 0x263   : >> { %v2270_v31 = vpop.permute.xlu0 %703 }
 0x264   : >> { %v920_v34 = vsel %vm743_vm8, %v901_v19, %v2270_v31 }
 0x265   : >> { %v928_v50 = vmul.f32 %v2002_v39, %v920_v34 }
 0x267   : >> { %948 = vrot.lane.b32.xlu0 %v928_v50, %s1653_s10 }
 0x26a   : >> { %v821_v33 = vpop.permute.xlu1 %820 }
 0x26b   : >> { %v840_v35 = vsel %vm670_vm4, %v821_v33, %v2265_v52  ;;  %v2278_v51 = vpop.permute.xlu0 %632 }
 0x26c   : >> { %v848_v61 = vmul.f32 %v1947_v14, %v840_v35  ;;  %v841_v26 = vsel %vm670_vm4, %v823_v16, %v2278_v51 }
 0x26d   : >> { %v849_v25 = vmul.f32 %v1952_v15, %v841_v26 }
 0x26e   : >> { %868 = vrot.lane.b32.xlu1 %v848_v61, %s1653_s10 }
 0x26f   : >> { %870 = vrot.lane.b32.xlu2 %v849_v25, %s1653_s10  ;;  %v2298_v25 = vpop.permute.xlu2 %707 }
 0x272   : >> { %v2286_v34 = vpop.permute.xlu1 %705 }
 0x273   : >> { %v903_v50 = vpop.permute.xlu0 %902 }
 0x274   : >> { %v921_v19 = vsel %vm743_vm8, %v903_v50, %v2286_v34 }
 0x275   : >> { %v929_v33 = vmul.f32 %v2007_v40, %v921_v19 }
 0x277   : >> { %950 = vrot.lane.b32.xlu1 %v929_v33, %s1653_s10  ;;  %v918_v33 = vsel %vm743_vm8, %v897_v54, %v2248_v12  ;;  %v2306_v49 = vpop.permute.xlu2 %709  ;;  %v919_v54 = vsel %vm743_vm8, %v899_v45, %v2268_v18 }
 0x278   : >> { %2659 = vst [vmem:[#allocation27_spill] sm:$0xff] %v2306_v49 }
 0x27a   : >> { %v825_v35 = vpop.permute.xlu1 %824 }
 0x27b   : >> { %v2292_v13 = vpop.permute.xlu0 %634 }
 0x27c   : >> { %v842_v26 = vsel %vm670_vm4, %v825_v35, %v2292_v13 }
 0x27d   : >> { %v850_v61 = vmul.f32 %v2657_v20, %v842_v26 }
 0x27f   : >> { %872 = vrot.lane.b32.xlu1 %v850_v61, %s1653_s10 }
 0x282   : >> { %v827_v16 = vpop.permute.xlu1 %826 }
 0x283   : >> { %v905_v44 = vpop.permute.xlu0 %904 }
 0x284   : >> { %v922_v50 = vsel %vm743_vm8, %v905_v44, %v2298_v25 }
 0x285   : >> { %v930_v19 = vmul.f32 %v2658_v46, %v922_v50  ;;  %v926_v50 = vmul.f32 %v1986_v28, %v918_v33 }
 0x287   : >> { %952 = vrot.lane.b32.xlu0 %v930_v19, %s1653_s10 }
 0x28a   : >> { %v907_v35 = vpop.permute.xlu1 %906 }
 0x28b   : >> { %v923_v26 = vsel %vm743_vm8, %v907_v35, %v2306_v49  ;;  %v2310_v61 = vpop.permute.xlu0 %636  ;;  %v839_v35 = vsel %vm670_vm4, %v819_v24, %v2254_v57 }
 0x28c   : >> { %v931_v7 = vmul.f32 %v2660_v53, %v923_v26  ;;  %v843_v44 = vsel %vm670_vm4, %v827_v16, %v2310_v61  ;;  %v927_v26 = vmul.f32 %v1991_v32, %v919_v54  ;;  %v847_v16 = vmul.f32 %v1942_v23, %v839_v35 }
 0x28d   : >> { %v851_v19 = vmul.f32 %v1965_v21, %v843_v44 }
 0x28e   : >> { %954 = vrot.lane.b32.xlu1 %v931_v7, %s1653_s10  ;;  %v836_v7 = vsel %vm670_vm4, %v2238_v37, %v2252_v47  ;;  %v837_v37 = vsel %vm670_vm4, %v2258_v58, %v2256_v60 }
 0x28f   : >> { %944 = vrot.lane.b32.xlu0 %v926_v50, %s1653_s10  ;;  %874 = vrot.lane.b32.xlu2 %v851_v19, %s1653_s10  ;;  %v844_v24 = vmul.f32 %v1926_v9, %v836_v7  ;;  %v845_v35 = vmul.f32 %v1931_v10, %v837_v37 }
 0x292   : >> { %v895_v50 = vpop.permute.xlu1 %894 }
 0x293   : >> { %v893_v33 = vpop.permute.xlu0 %892  ;;  %v917_v19 = vsel %vm743_vm8, %v895_v50, %v2244_v8 }
 0x294   : >> { %v916_v45 = vsel %vm743_vm8, %v893_v33, %v2250_v38  ;;  %v925_v54 = vmul.f32 %v1981_v27, %v917_v19 }
 0x295   : >> { %v924_v44 = vmul.f32 %v1970_v22, %v916_v45 }
 0x296   : >> { %946 = vrot.lane.b32.xlu1 %v927_v26, %s1653_s10  ;;  %v793_v26 = vpop.permute.xlu2 %792 }
 0x297   : >> { %782 = vrot.lane.b32.xlu0 %v1881_v29, %s1653_s10  ;;  %866 = vrot.lane.b32.xlu2 %v847_v16, %s1653_s10  ;;  %v810_v49 = vmul.f32 %v793_v26, %v2210_v5 }
 0x29b   : >> { %v795_v16 = vpop.permute.xlu0 %794 }
 0x29e   : >> { %860 = vrot.lane.b32.xlu1 %v844_v24, %s1653_s10  ;;  %v789_v33 = vpop.permute.xlu2 %788 }
 0x29f   : >> { %780 = vrot.lane.b32.xlu2 %v1876_v55, %s1653_s10  ;;  %940 = vrot.lane.b32.xlu0 %v924_v44, %s1653_s10  ;;  %v808_v43 = vmul.f32 %v789_v33, %v2191_v17 }
 0x2a3   : >> { %v791_v7 = vpop.permute.xlu0 %790 }
 0x2a4   : >> { %v809_v58 = vmul.f32 %v791_v7, %v2198_v30 }
 0x2a6   : >> { %942 = vrot.lane.b32.xlu1 %v925_v54, %s1653_s10  ;;  %v785_v24 = vpop.permute.xlu2 %784 }
 0x2a7   : >> { %862 = vrot.lane.b32.xlu2 %v845_v35, %s1653_s10  ;;  %s1312_s10 = sshll.u32 (%p526_p11), %s2133_s16, 4  ;;  %s1313_s10 = int_to_ptr.vmem [resolvable:$true] %s1312_s10 }
 0x2ab   : >> { %v787_v50 = vpop.permute.xlu0 %786 }
 0x2c9   : >> { %v865_v45 = vpop.permute.xlu1 %864  ;;  %v871_v48 = vpop.permute.xlu2 %870 }
 0x2ca   : >> { %v889_v59 = vadd.f32 %v871_v48, %v809_v58 }
 0x2d9   : >> { %v949_v37 = vpop.permute.xlu0 %948 }
 0x2e0   : >> { %v869_v44 = vpop.permute.xlu1 %868 }
 0x2e1   : >> { %v888_v19 = vadd.f32 %v869_v44, %v808_v43  ;;  %v811_v43 = vmul.f32 %v795_v16, %v2218_v6 }
 0x2e3   : >> { %v968_v54 = vadd.f32 %v949_v37, %v888_v19  ;;  %v806_v37 = vmul.f32 %v785_v24, %v2176_v36 }
 0x2e5   : >> { %v886_v26 = vadd.f32 %v865_v45, %v806_v37  ;;  %v979_v37 = vpack.c.bf16 %v2218_v6, %v2210_v5 }
 0x2e9   : >> { %v951_v53 = vpop.permute.xlu1 %950  ;;  %v875_v3 = vpop.permute.xlu2 %874 }
 0x2ea   : >> { %v969_v46 = vadd.f32 %v951_v53, %v889_v59  ;;  %v891_v48 = vadd.f32 %v875_v3, %v811_v43 }
 0x2ec   : >> { %v974_v35 = vpack.c.bf16 %v969_v46, %v968_v54  ;;  %v807_v54 = vmul.f32 %v787_v50, %v2184_v41 }
 0x2ee   : >> { %988 = vrot.lane.b32.xlu0 %v974_v35, %s1654_s11 }
 0x2f1   : >> { %v873_v20 = vpop.permute.xlu1 %872  ;;  %v867_v44 = vpop.permute.xlu2 %866 }
 0x2f2   : >> { %v890_v46 = vadd.f32 %v873_v20, %v810_v49  ;;  %v887_v16 = vadd.f32 %v867_v44, %v807_v54  ;;  %v978_v54 = vpack.c.bf16 %v2198_v30, %v2191_v17 }
 0x2f6   : >> { %648 = vrot.lane.b32.xlu0 %v2168_v42, %s1655_s12 }
 0x2f9   : >> { %v953_v33 = vpop.permute.xlu0 %952 }
 0x2fa   : >> { %v970_v59 = vadd.f32 %v953_v33, %v890_v46  ;;  %v781_v33 = vpop.permute.xlu2 %780 }
 0x2fb   : >> { %v804_v43 = vmul.f32 %v781_v33, %v2160_v1 }
 0x2fe   : >> { %721 = vrot.lane.b32.xlu0 %v2168_v42, %s1656_s13 }
 0x300   : >> { %v955_v53 = vpop.permute.xlu1 %954 }
 0x301   : >> { %v971_v7 = vadd.f32 %v955_v53, %v891_v48  ;;  %v945_v19 = vpop.permute.xlu0 %944 }
 0x302   : >> { %v966_v3 = vadd.f32 %v945_v19, %v886_v26  ;;  %v863_v46 = vpop.permute.xlu2 %862  ;;  %v977_v26 = vpack.c.bf16 %v2184_v41, %v2176_v36 }
 0x303   : >> { %v975_v58 = vpack.c.bf16 %v971_v7, %v970_v59 }
 0x305   : >> { %990 = vrot.lane.b32.xlu2 %v975_v58, %s1654_s11 }
 0x306   : >> { %723 = vrot.lane.b32.xlu0 %v2176_v36, %s1656_s13 }
 0x308   : >> { %v947_v35 = vpop.permute.xlu1 %946 }
 0x309   : >> { %v967_v20 = vadd.f32 %v947_v35, %v887_v16  ;;  %v783_v24 = vpop.permute.xlu0 %782  ;;  %v976_v16 = vpack.c.bf16 %v2168_v42, %v2160_v1 }
 0x30a   : >> { %v805_v45 = vmul.f32 %v783_v24, %v2168_v42 }
 0x30b   : >> { %v973_v49 = vpack.c.bf16 %v967_v20, %v966_v3 }
 0x30c   : >> { %v885_v53 = vadd.f32 %v863_v46, %v805_v45 }
 0x30d   : >> { %646 = vrot.lane.b32.xlu2 %v2160_v1, %s1655_s12  ;;  %986 = vrot.lane.b32.xlu1 %v973_v49, %s1654_s11 }
 0x30e   : >> { %656 = vrot.lane.b32.xlu0 %v2198_v30, %s1655_s12 }
 0x310   : >> { %v861_v50 = vpop.permute.xlu1 %860 }
 0x311   : >> { %v884_v48 = vadd.f32 %v861_v50, %v804_v43  ;;  %v941_v59 = vpop.permute.xlu0 %940 }
 0x313   : >> { %v964_v44 = vadd.f32 %v941_v59, %v884_v48 }
 0x315   : >> { %719 = vrot.lane.b32.xlu2 %v2160_v1, %s1656_s13 }
 0x316   : >> { %658 = vrot.lane.b32.xlu0 %v2210_v5, %s1655_s12 }
 0x318   : >> { %v943_v7 = vpop.permute.xlu1 %942 }
 0x319   : >> { %v965_v58 = vadd.f32 %v943_v7, %v885_v53 }
 0x31b   : >> { %v972_v19 = vpack.c.bf16 %v965_v58, %v964_v44 }
 0x31d   : >> { %652 = vrot.lane.b32.xlu2 %v2184_v41, %s1655_s12  ;;  %984 = vrot.lane.b32.xlu1 %v972_v19, %s1654_s11  ;;  %v606_v19 = vmul.f32 %v2160_v1, %v1876_v55  ;;  %s1314_s11 = sshll.u32 (%p526_p11), %s1311_s17, 4  ;;  %s1315_s11 = int_to_ptr.hbm [resolvable:$true] %s1314_s11 }
 0x31e   : >> { %733 = vrot.lane.b32.xlu0 %v2218_v6, %s1656_s13 }
 0x325   : >> { %654 = vrot.lane.b32.xlu2 %v2191_v17, %s1655_s12  ;;  %650 = vrot.lane.b32.xlu1 %v2176_v36, %s1655_s12 }
 0x32d   : >> { %729 = vrot.lane.b32.xlu2 %v2198_v30, %s1656_s13  ;;  %725 = vrot.lane.b32.xlu1 %v2184_v41, %s1656_s13 }
 0x335   : >> { %731 = vrot.lane.b32.xlu2 %v2210_v5, %s1656_s13  ;;  %727 = vrot.lane.b32.xlu1 %v2191_v17, %s1656_s13 }
 0x33d   : >> { %660 = vrot.lane.b32.xlu1 %v2218_v6, %s1655_s12  ;;  %s1589_s12 = sshra.s32 (%p526_p11), %s1315_s11, 4  ;;  %s1590_s12 = int_to_ptr.hbm [resolvable:$true] %s1589_s12 }
 0x33e   : > { %s1591_s13 = scalar_lea.hbm (%p526_p11), %s1590_s12, 64  ;;  %p1596_p1 = scmp.lt.s32.totalorder (%p526_p11), %s1590_s12, %s2593_s6 }
 0x33f   : > { %p1592_p12 = scmp.ne.s32.totalorder (%p526_p11), %s1590_s12, %s1591_s13  ;;  %p1597_p2 = scmp.lt.s32.totalorder (%p526_p11), %s1595_s20, %s1591_s13 }
 0x341   : > { %p1593_p13 = pnand (%p526_p11), %p1592_p12, %p1733_p5  ;;  %p1598_p3 = por (%p526_p11), %p1597_p2, %p1596_p1 }
 0x343   : > { %p1594_p0 = pneg (%p526_p11), %p1593_p13 }
 0x345   : >> { %1140 = vrot.lane.b32.xlu1 %v979_v37, %s1657_s18  ;;  %v607_v37 = vmul.f32 %v2168_v42, %v1881_v29  ;;  %p1599_p4 = pnand (%p526_p11), %p1598_p3, %p1594_p0 }
 0x34d   : >> { %1138 = vrot.lane.b32.xlu1 %v978_v54, %s1657_s18 }
 0x355   : >> { %1136 = vrot.lane.b32.xlu1 %v977_v26, %s1657_s18 }
 0x35d   : >> { %1134 = vrot.lane.b32.xlu1 %v976_v16, %s1657_s18 }
 0x35f   : >> { %v991_v35 = vpop.permute.xlu2 %990 }
 0x360   : >> { %v1015_v3 = vsel %vm992_vm9, %v991_v35, 0  ;;  %v989_v20 = vpop.permute.xlu0 %988 }
 0x361   : >> { %1021 = vmatpush.bf16.xpose.msra.mxu1 %v1015_v3  ;;  %v1012_v49 = vsel %vm992_vm9, %v989_v20, 0 }
 0x367   : >> { %v647_v33 = vpop.permute.xlu2 %646 }
 0x368   : >> { %v649_v24 = vpop.permute.xlu0 %648  ;;  %v671_v46 = vsel %vm670_vm4, %v2252_v47, %v647_v33 }
 0x369   : >> { %1022 = vmatpush.bf16.xpose.msra.mxu1 %v1012_v49  ;;  %v672_v53 = vsel %vm670_vm4, %v2256_v60, %v649_v24  ;;  %v679_v44 = vmul.f32 %v1926_v9, %v671_v46 }
 0x36a   : >> { %v680_v58 = vmul.f32 %v1931_v10, %v672_v53 }
 0x36b   : >> { %v687_v26 = vadd.f32 %v679_v44, %v606_v19 }
 0x36f   : >> { %v720_v45 = vpop.permute.xlu2 %719 }
 0x370   : >> { %v722_v48 = vpop.permute.xlu0 %721  ;;  %v744_v59 = vsel %vm743_vm8, %v2250_v38, %v720_v45  ;;  %v688_v38 = vadd.f32 %v680_v58, %v607_v37 }
 0x371   : >> { %v745_v7 = vsel %vm743_vm8, %v2244_v8, %v722_v48  ;;  %v752_v47 = vmul.f32 %v1970_v22, %v744_v59  ;;  %v609_v48 = vmul.f32 %v2184_v41, %v1898_v63 }
 0x372   : >> { %v753_v60 = vmul.f32 %v1981_v27, %v745_v7 }
 0x373   : >> { %v760_v8 = vadd.f32 %v752_v47, %v687_v26 }
 0x374   : >> { %v761_v35 = vadd.f32 %v753_v60, %v688_v38  ;;  %v610_v38 = vmul.f32 %v2191_v17, %v1903_v0 }
 0x376   : >> { %v768_v20 = vpack.c.bf16 %v761_v35, %v760_v8 }
 0x377   : >> { %v653_v3 = vpop.permute.xlu2 %652 }
 0x378   : >> { %v674_v42 = vsel %vm670_vm4, %v2254_v57, %v653_v3  ;;  %v724_v33 = vpop.permute.xlu0 %723 }
 0x379   : >> { %v746_v45 = vsel %vm743_vm8, %v2248_v12, %v724_v33 }
 0x37a   : >> { %v754_v7 = vmul.f32 %v1986_v28, %v746_v45 }
 0x37f   : >> { %v987_v50 = vpop.permute.xlu1 %986  ;;  %v655_v53 = vpop.permute.xlu2 %654 }
 0x380   : >> { %v1009_v43 = vsel %vm992_vm9, %v987_v50, 0  ;;  %v682_v50 = vmul.f32 %v1942_v23, %v674_v42  ;;  %v657_v37 = vpop.permute.xlu0 %656  ;;  %v675_v41 = vsel %vm670_vm4, %v2265_v52, %v655_v53 }
 0x381   : >> { %1023 = vmatpush.bf16.xpose.msra.mxu1 %v1009_v43  ;;  %v608_v43 = vmul.f32 %v2176_v36, %v1893_v62  ;;  %v676_v60 = vsel %vm670_vm4, %v2278_v51, %v657_v37  ;;  %v611_v51 = vmul.f32 %v2198_v30, %v1909_v2 }
 0x382   : >> { %v690_v59 = vadd.f32 %v682_v50, %v609_v48  ;;  %v2661_v48 = vld [vmem:[#allocation27_spill] sm:$0xff] }
 0x387   : >> { %v730_v12 = vpop.permute.xlu2 %729 }
 0x388   : >> { %v749_v26 = vsel %vm743_vm8, %v2286_v34, %v730_v12 }
 0x389   : >> { %v757_v3 = vmul.f32 %v2007_v40, %v749_v26 }
 0x38f   : >> { %v985_v54 = vpop.permute.xlu1 %984  ;;  %v732_v33 = vpop.permute.xlu2 %731 }
 0x390   : >> { %v1006_v16 = vsel %vm992_vm9, %v985_v54, 0  ;;  %v683_v54 = vmul.f32 %v1947_v14, %v675_v41  ;;  %v750_v45 = vsel %vm743_vm8, %v2298_v25, %v732_v33 }
 0x391   : >> { %1024 = vmatpush.bf16.xpose.msra.mxu1 %v1006_v16  ;;  %v684_v16 = vmul.f32 %v1952_v15, %v676_v60 }
 0x392   : >> { %v691_v35 = vadd.f32 %v683_v54, %v610_v38 }
 0x397   : >> { %v651_v49 = vpop.permute.xlu1 %650 }
 0x398   : >> { %v673_v1 = vsel %vm670_vm4, %v2260_v56, %v651_v49  ;;  %1431 = vmatmul.msk.bf16.vlgmr.msra.gmra.mxu1 %vm992_vm9, %v768_v20  ;;  %v692_v20 = vadd.f32 %v684_v16, %v611_v51 }
 0x399   : >> { %v681_v24 = vmul.f32 %v1936_v11, %v673_v1 }
 0x39a   : >> { %v765_v1 = vadd.f32 %v757_v3, %v692_v20 }
 0x39b   : >> { %v689_v56 = vadd.f32 %v681_v24, %v608_v43  ;;  %v613_v43 = vmul.f32 %v2218_v6, %v1919_v4 }
 0x39d   : >> { %v762_v19 = vadd.f32 %v754_v7, %v689_v56  ;;  %v2662_v56 = vld [vmem:[#allocation7_spill] sm:$0xff] }
 0x39f   : >> { %v726_v46 = vpop.permute.xlu1 %725 }
 0x3a0   : >> { %v747_v57 = vsel %vm743_vm8, %v2268_v18, %v726_v46 }
 0x3a1   : >> { %v755_v44 = vmul.f32 %v1991_v32, %v747_v57 }
 0x3a3   : >> { %v763_v58 = vadd.f32 %v755_v44, %v690_v59  ;;  %v2663_v59 = vld [vmem:[#allocation6_spill] sm:$0xff]  ;;  %v2664_v44 = vld [vmem:[#allocation9_spill] sm:$0xff] }
 0x3a4   : >> { %v612_v7 = vmul.f32 %v2210_v5, %v2663_v59 }
 0x3a5   : >> { %v769_v36 = vpack.c.bf16 %v763_v58, %v762_v19  ;;  %v758_v58 = vmul.f32 %v2664_v44, %v750_v45  ;;  %v2665_v19 = vld [vmem:[#allocation12_spill] sm:$0xff] }
 0x3a7   : >> { %v728_v47 = vpop.permute.xlu1 %727 }
 0x3a8   : >> { %1432 = vmatmul.msk.bf16.gmra.mxu1 %vm992_vm9, %v769_v36  ;;  %v748_v18 = vsel %vm743_vm8, %v2270_v31, %v728_v47  ;;  %v659_v31 = vpop.permute.xlu0 %658 }
 0x3a9   : >> { %v756_v8 = vmul.f32 %v2002_v39, %v748_v18  ;;  %v677_v30 = vsel %vm670_vm4, %v2292_v13, %v659_v31 }
 0x3aa   : >> { %v685_v46 = vmul.f32 %v2662_v56, %v677_v30 }
 0x3ab   : >> { %v764_v49 = vadd.f32 %v756_v8, %v691_v35 }
 0x3ac   : >> { %v693_v36 = vadd.f32 %v685_v46, %v612_v7 }
 0x3ad   : >> { %v770_v42 = vpack.c.bf16 %v765_v1, %v764_v49 }
 0x3ae   : >> { %v766_v37 = vadd.f32 %v758_v58, %v693_v36 }
 0x3af   : >> { %v661_v52 = vpop.permute.xlu1 %660 }
 0x3b0   : >> { %v678_v34 = vsel %vm670_vm4, %v2310_v61, %v661_v52  ;;  %v734_v24 = vpop.permute.xlu0 %733 }
 0x3b1   : >> { %v686_v50 = vmul.f32 %v1965_v21, %v678_v34  ;;  %v751_v61 = vsel %vm743_vm8, %v2661_v48, %v734_v24 }
 0x3b2   : >> { %v759_v13 = vmul.f32 %v2665_v19, %v751_v61 }
 0x3b3   : >> { %v694_v53 = vadd.f32 %v686_v50, %v613_v43 }
 0x3b5   : >> { %v767_v6 = vadd.f32 %v759_v13, %v694_v53 }
 0x3b7   : >> { %v1141_v17 = vpop.permute.xlu1 %1140  ;;  %v771_v47 = vpack.c.bf16 %v767_v6, %v766_v37 }
 0x3b8   : >> { %1433 = vmatmul.msk.bf16.gmra.mxu1 %vm992_vm9, %v770_v42  ;;  %1162 = vmatpush.bf16.msra.mxu2 %v1141_v17 }
 0x3bf   : >> { %v1139_v57 = vpop.permute.xlu1 %1138 }
 0x3c0   : >> { %1163 = vmatpush.bf16.msra.mxu2 %v1139_v57 }
 0x3c7   : >> { %v1137_v25 = vpop.permute.xlu1 %1136 }
 0x3c8   : >> { %1434 = vmatmul.msk.bf16.gmra.mxu1 %vm992_vm9, %v771_v47  ;;  %1164 = vmatpush.bf16.msra.mxu2 %v1137_v25 }
 0x3cf   : >> { %v1135_v41 = vpop.permute.xlu1 %1134 }
 0x3d0   : >> { %1165 = vmatpush.bf16.msra.mxu2 %v1135_v41 }
 0x415   : >> { %v1026_v12 = vpop.f32.mrf.mxu1 }
 0x416   : >> { %v1046_v5 = vsel %vm508_vm5, %v1026_v12, -1e+30 }
 0x417   : >> { %v1054_v54 = vsel %vm259_vm0, %v1046_v5, -inf }
 0x418   : >> { %1055 = vmax.xlane.f32.xlu2 %v1054_v54 }
 0x41d   : >> { %v1028_v26 = vpop.f32.mrf.mxu1 }
 0x41e   : >> { %v1047_v16 = vsel %vm509_vm6, %v1028_v26, -1e+30 }
 0x41f   : >> { %v1057_v8 = vsel %vm259_vm0, %v1047_v16, -inf }
 0x420   : >> { %1058 = vmax.xlane.f32.xlu0 %v1057_v8 }
 0x425   : >> { %v1031_v52 = vpop.f32.mrf.mxu1 }
 0x426   : >> { %v1048_v51 = vsel %vm510_vm7, %v1031_v52, -1e+30 }
 0x427   : >> { %v1060_v3 = vsel %vm259_vm0, %v1048_v51, -inf }
 0x428   : >> { %1061 = vmax.xlane.f32.xlu1 %v1060_v3 }
 0x42d   : >> { %v1033_v31 = vpop.f32.mrf.mxu1 }
 0x42e   : >> { %v1049_v49 = vsel %vm511_vm10, %v1033_v31, -1e+30 }
 0x42f   : >> { %v1063_v1 = vsel %vm259_vm0, %v1049_v49, -inf }
 0x430   : >> { %1064 = vmax.xlane.f32.xlu2 %v1063_v1 }
 0x435   : >> { %v1036_v42 = vpop.f32.mrf.mxu1 }
 0x436   : >> { %v1050_v17 = vsel %vm512_vm12, %v1036_v42, -1e+30 }
 0x437   : >> { %v1066_v33 = vsel %vm259_vm0, %v1050_v17, -inf }
 0x438   : >> { %1067 = vmax.xlane.f32.xlu2 %v1066_v33 }
 0x43d   : >> { %v1038_v24 = vpop.f32.mrf.mxu1 }
 0x43e   : >> { %v1051_v30 = vsel %vm513_vm13, %v1038_v24, -1e+30 }
 0x43f   : >> { %v1069_v43 = vsel %vm259_vm0, %v1051_v30, -inf }
 0x440   : >> { %1070 = vmax.xlane.f32.xlu0 %v1069_v43 }
 0x445   : >> { %v1041_v45 = vpop.f32.mrf.mxu1 }
 0x446   : >> { %v1052_v61 = vsel %vm514_vm14, %v1041_v45, -1e+30 }
 0x447   : >> { %v1072_v56 = vsel %vm259_vm0, %v1052_v61, -inf }
 0x448   : >> { %1073 = vmax.xlane.f32.xlu2 %v1072_v56 }
 0x44d   : >> { %v1043_v46 = vpop.f32.mrf.mxu1 }
 0x44e   : >> { %v1053_v57 = vsel %vm515_vm15, %v1043_v46, -1e+30 }
 0x44f   : >> { %v1075_v59 = vsel %vm259_vm0, %v1053_v57, -inf }
 0x450   : >> { %1076 = vmax.xlane.f32.xlu0 %v1075_v59 }
 0x48b   : >> { %v1056_v7 = vpop.xlane.xlu2 %1055 }
 0x48c   : >> { %v1078_v44 = vsub.f32 %v1046_v5, %v1056_v7 }
 0x48e   : >> { %v1086_v58 = vmul.f32 1.442695, %v1078_v44 }
 0x490   : >> { %1543 = vpow2.f32 %v1086_v58  ;;  %v1461_v58 = vld [vmem:[%s1217_s15] sm:$0xff] }
 0x491   : >> { %1245 = vmatpush.bf16.msra.mxu3 %v1461_v58  ;;  %v1205_v58 = vld [vmem:[#allocation2 + $0x10] sm:$0xff] }
 0x493   : >> { %v1059_v19 = vpop.xlane.xlu0 %1058 }
 0x494   : >> { %v1079_v13 = vsub.f32 %v1047_v16, %v1059_v19 }
 0x496   : >> { %v1544_v36 = vpop.eup %1543  ;;  %v1088_v6 = vmul.f32 1.442695, %v1079_v13 }
 0x497   : >> { %v1102_v37 = vsel %vm259_vm0, %v1544_v36, 0.0 }
 0x498   : >> { %1545 = vpow2.f32 %v1088_v6  ;;  %1103 = vadd.xlane.f32.xlu2 %v1102_v37 }
 0x49b   : >> { %v1062_v47 = vpop.xlane.xlu1 %1061 }
 0x49c   : >> { %v1080_v25 = vsub.f32 %v1048_v51, %v1062_v47 }
 0x49e   : >> { %v1546_v41 = vpop.eup %1545  ;;  %v1090_v12 = vmul.f32 1.442695, %v1080_v25 }
 0x49f   : >> { %v1105_v18 = vsel %vm259_vm0, %v1546_v41, 0.0  ;;  %v1126_v54 = vpack.c.bf16 %v1546_v41, %v1544_v36 }
 0x4a0   : >> { %1547 = vpow2.f32 %v1090_v12  ;;  %1106 = vadd.xlane.f32.xlu0 %v1105_v18 }
 0x4a1   : >> { %1435 = vmatmul.msk.bf16.vlgmr.msra.gmra.mxu2 %vm259_vm0, %v1126_v54 }
 0x4a3   : >> { %v1065_v5 = vpop.xlane.xlu2 %1064 }
 0x4a4   : >> { %v1081_v26 = vsub.f32 %v1049_v49, %v1065_v5 }
 0x4a6   : >> { %v1548_v38 = vpop.eup %1547  ;;  %v1092_v16 = vmul.f32 1.442695, %v1081_v26 }
 0x4a7   : >> { %v1108_v8 = vsel %vm259_vm0, %v1548_v38, 0.0 }
 0x4a8   : >> { %1549 = vpow2.f32 %v1092_v16  ;;  %1109 = vadd.xlane.f32.xlu2 %v1108_v8 }
 0x4ab   : >> { %v1068_v52 = vpop.xlane.xlu2 %1067 }
 0x4ac   : >> { %v1082_v35 = vsub.f32 %v1050_v17, %v1068_v52 }
 0x4ae   : >> { %v1550_v51 = vpop.eup %1549  ;;  %v1094_v3 = vmul.f32 1.442695, %v1082_v35 }
 0x4af   : >> { %v1111_v31 = vsel %vm259_vm0, %v1550_v51, 0.0  ;;  %v1127_v20 = vpack.c.bf16 %v1550_v51, %v1548_v38 }
 0x4b0   : >> { %1551 = vpow2.f32 %v1094_v3  ;;  %1112 = vadd.xlane.f32.xlu0 %v1111_v31 }
 0x4b1   : >> { %1436 = vmatmul.msk.bf16.gmra.mxu2 %vm259_vm0, %v1127_v20 }
 0x4b3   : >> { %v1071_v1 = vpop.xlane.xlu0 %1070 }
 0x4b4   : >> { %v1083_v42 = vsub.f32 %v1051_v30, %v1071_v1 }
 0x4b6   : >> { %v1552_v49 = vpop.eup %1551  ;;  %v1096_v34 = vmul.f32 1.442695, %v1083_v42 }
 0x4b7   : >> { %v1114_v33 = vsel %vm259_vm0, %v1552_v49, 0.0 }
 0x4b8   : >> { %1553 = vpow2.f32 %v1096_v34  ;;  %1115 = vadd.xlane.f32.xlu1 %v1114_v33 }
 0x4bb   : >> { %v1074_v24 = vpop.xlane.xlu2 %1073 }
 0x4bc   : >> { %v1084_v50 = vsub.f32 %v1052_v61, %v1074_v24 }
 0x4be   : >> { %v1554_v17 = vpop.eup %1553  ;;  %v1098_v43 = vmul.f32 1.442695, %v1084_v50 }
 0x4bf   : >> { %v1117_v45 = vsel %vm259_vm0, %v1554_v17, 0.0  ;;  %v1128_v48 = vpack.c.bf16 %v1554_v17, %v1552_v49 }
 0x4c0   : >> { %1555 = vpow2.f32 %v1098_v43  ;;  %1118 = vadd.xlane.f32.xlu2 %v1117_v45 }
 0x4c1   : >> { %1437 = vmatmul.msk.bf16.gmra.mxu2 %vm259_vm0, %v1128_v48 }
 0x4c3   : >> { %v1077_v56 = vpop.xlane.xlu0 %1076 }
 0x4c4   : >> { %v1085_v30 = vsub.f32 %v1053_v57, %v1077_v56 }
 0x4c6   : >> { %v1556_v46 = vpop.eup %1555  ;;  %v1100_v53 = vmul.f32 1.442695, %v1085_v30 }
 0x4c7   : >> { %v1120_v59 = vsel %vm259_vm0, %v1556_v46, 0.0 }
 0x4c8   : >> { %1557 = vpow2.f32 %v1100_v53  ;;  %1121 = vadd.xlane.f32.xlu0 %v1120_v59 }
 0x4ce   : >> { %v1558_v7 = vpop.eup %1557 }
 0x4cf   : >> { %v1123_v61 = vsel %vm259_vm0, %v1558_v7, 0.0  ;;  %v1129_v44 = vpack.c.bf16 %v1558_v7, %v1556_v46  ;;  %v1203_v46 = vld [vmem:[#allocation2] sm:$0xff]  ;;  %v1204_v7 = vld [vmem:[#allocation2 + $0x8] sm:$0xff] }
 0x4d0   : >> { %1124 = vadd.xlane.f32.xlu1 %v1123_v61 }
 0x4d1   : >> { %1438 = vmatmul.msk.bf16.gmra.mxu2 %vm259_vm0, %v1129_v44 }
 0x50b   : >> { %v1104_v57 = vpop.xlane.xlu2 %1103 }
 0x50c   : >> { %1559 = vrcp.f32 %v1104_v57 }
 0x512   : >> { %v1560_v36 = vpop.eup %1559 }
 0x513   : >> { %v1107_v19 = vpop.xlane.xlu0 %1106 }
 0x514   : >> { %1561 = vrcp.f32 %v1107_v19 }
 0x51a   : >> { %v1562_v6 = vpop.eup %1561 }
 0x51b   : >> { %v1110_v12 = vpop.xlane.xlu2 %1109 }
 0x51c   : >> { %1563 = vrcp.f32 %v1110_v12 }
 0x522   : >> { %v1564_v5 = vpop.eup %1563 }
 0x523   : >> { %v1113_v18 = vpop.xlane.xlu0 %1112 }
 0x524   : >> { %v1167_v13 = vpop.f32.mrf.mxu2  ;;  %1565 = vrcp.f32 %v1113_v18 }
 0x525   : >> { %v1195_v47 = vmul.f32 %v1560_v36, %v1167_v13  ;;  %v1206_v13 = vld [vmem:[#allocation2 + $0x18] sm:$0xff] }
 0x52a   : >> { %v1566_v26 = vpop.eup %1565 }
 0x52b   : >> { %v1116_v35 = vpop.xlane.xlu1 %1115 }
 0x52c   : >> { %v1169_v37 = vpop.f32.mrf.mxu2  ;;  %1567 = vrcp.f32 %v1116_v35 }
 0x52d   : >> { %v1196_v25 = vmul.f32 %v1562_v6, %v1169_v37  ;;  %v1207_v37 = vld [vmem:[#allocation2 + $0x20] sm:$0xff] }
 0x52f   : >> { %v1211_v41 = vpack.c.bf16 %v1196_v25, %v1195_v47 }
 0x531   : >> { %1445 = vmatmul.msk.bf16.vlgmr.msra.gmra.mxu3 %vm992_vm9, %v1211_v41  ;;  %v1208_v41 = vld [vmem:[#allocation2 + $0x28] sm:$0xff] }
 0x532   : >> { %v1568_v31 = vpop.eup %1567 }
 0x533   : >> { %v1119_v51 = vpop.xlane.xlu2 %1118 }
 0x534   : >> { %v1172_v54 = vpop.f32.mrf.mxu2  ;;  %1569 = vrcp.f32 %v1119_v51 }
 0x535   : >> { %v1197_v16 = vmul.f32 %v1564_v5, %v1172_v54  ;;  %v1209_v54 = vld [vmem:[#allocation2 + $0x30] sm:$0xff] }
 0x53a   : >> { %v1570_v20 = vpop.eup %1569 }
 0x53b   : >> { %v1122_v33 = vpop.xlane.xlu0 %1121 }
 0x53c   : >> { %v1174_v38 = vpop.f32.mrf.mxu2  ;;  %1571 = vrcp.f32 %v1122_v33 }
 0x53d   : >> { %v1198_v8 = vmul.f32 %v1566_v26, %v1174_v38  ;;  %v1210_v38 = vld [vmem:[#allocation2 + $0x38] sm:$0xff] }
 0x53f   : >> { %v1212_v52 = vpack.c.bf16 %v1198_v8, %v1197_v16 }
 0x541   : >> { %1446 = vmatmul.msk.bf16.gmra.mxu3 %vm992_vm9, %v1212_v52 }
 0x542   : >> { %v1572_v17 = vpop.eup %1571 }
 0x543   : >> { %v1125_v24 = vpop.xlane.xlu1 %1124 }
 0x544   : >> { %v1177_v3 = vpop.f32.mrf.mxu2  ;;  %1573 = vrcp.f32 %v1125_v24 }
 0x545   : >> { %v1199_v42 = vmul.f32 %v1568_v31, %v1177_v3 }
 0x54a   : >> { %v1574_v43 = vpop.eup %1573 }
 0x54c   : >> { %v1179_v1 = vpop.f32.mrf.mxu2 }
 0x54d   : >> { %v1200_v49 = vmul.f32 %v1570_v20, %v1179_v1 }
 0x54f   : >> { %v1213_v34 = vpack.c.bf16 %v1200_v49, %v1199_v42 }
 0x551   : >> { %1447 = vmatmul.msk.bf16.gmra.mxu3 %vm992_vm9, %v1213_v34 }
 0x554   : >> { %v1182_v50 = vpop.f32.mrf.mxu2 }
 0x555   : >> { %v1201_v48 = vmul.f32 %v1572_v17, %v1182_v50 }
 0x55c   : >> { %v1184_v45 = vpop.f32.mrf.mxu2 }
 0x55d   : >> { %v1202_v56 = vmul.f32 %v1574_v43, %v1184_v45 }
 0x55f   : >> { %v1214_v30 = vpack.c.bf16 %v1202_v56, %v1201_v48 }
 0x561   : >> { %1448 = vmatmul.msk.bf16.gmra.mxu3 %vm992_vm9, %v1214_v30 }
 0x5b4   : >> { %v1247_v53 = vpop.f32.mrf.mxu3 }
 0x5b5   : >> { %v1267_v59 = vadd.f32 %v1247_v53, %v1203_v46 }
 0x5b7   : >> { %1275 = vst.msk [vmem:[#allocation2] sm:$0xff] %vm259_vm0, %v1267_v59 }
 0x5bc   : >> { %v1249_v61 = vpop.f32.mrf.mxu3 }
 0x5bd   : >> { %v1268_v44 = vadd.f32 %v1249_v61, %v1204_v7 }
 0x5be   : > { %v1283_v52 = vld [vmem:[#allocation2] sm:$0xff] (%p526_p11) }
 0x5bf   : >> { %1276 = vst.msk [vmem:[#allocation2 + $0x8] sm:$0xff] %vm259_vm0, %v1268_v44 }
 0x5c0   : > { %1291 = vst.msk [vmem:[%s2133_s16] sm:$0xff] (%p526_p11), %vm259_vm0, %v1283_v52 }
 0x5c4   : >> { %v1252_v57 = vpop.f32.mrf.mxu3 }
 0x5c5   : >> { %v1269_v19 = vadd.f32 %v1252_v57, %v1205_v58 }
 0x5c6   : > { %v1284_v35 = vld [vmem:[#allocation2 + $0x8] sm:$0xff] (%p526_p11) }
 0x5c7   : >> { %1277 = vst.msk [vmem:[#allocation2 + $0x10] sm:$0xff] %vm259_vm0, %v1269_v19 }
 0x5c8   : > { %1292 = vst.msk [vmem:[%s2133_s16 + $0x8] sm:$0xff] (%p526_p11), %vm259_vm0, %v1284_v35 }
 0x5cc   : >> { %v1254_v36 = vpop.f32.mrf.mxu3 }
 0x5cd   : >> { %v1270_v6 = vadd.f32 %v1254_v36, %v1206_v13 }
 0x5ce   : > { %v1285_v51 = vld [vmem:[#allocation2 + $0x10] sm:$0xff] (%p526_p11) }
 0x5cf   : >> { %1278 = vst.msk [vmem:[#allocation2 + $0x18] sm:$0xff] %vm259_vm0, %v1270_v6 }
 0x5d0   : > { %1293 = vst.msk [vmem:[%s2133_s16 + $0x10] sm:$0xff] (%p526_p11), %vm259_vm0, %v1285_v51 }
 0x5d4   : >> { %v1257_v47 = vpop.f32.mrf.mxu3 }
 0x5d5   : >> { %v1271_v25 = vadd.f32 %v1257_v47, %v1207_v37 }
 0x5d6   : > { %v1286_v3 = vld [vmem:[#allocation2 + $0x18] sm:$0xff] (%p526_p11) }
 0x5d7   : >> { %1279 = vst.msk [vmem:[#allocation2 + $0x20] sm:$0xff] %vm259_vm0, %v1271_v25 }
 0x5d8   : > { %1294 = vst.msk [vmem:[%s2133_s16 + $0x18] sm:$0xff] (%p526_p11), %vm259_vm0, %v1286_v3 }
 0x5dc   : >> { %v1259_v12 = vpop.f32.mrf.mxu3 }
 0x5dd   : >> { %v1272_v18 = vadd.f32 %v1259_v12, %v1208_v41 }
 0x5de   : > { %v1287_v55 = vld [vmem:[#allocation2 + $0x20] sm:$0xff] (%p526_p11) }
 0x5df   : >> { %1280 = vst.msk [vmem:[#allocation2 + $0x28] sm:$0xff] %vm259_vm0, %v1272_v18 }
 0x5e0   : > { %1295 = vst.msk [vmem:[%s2133_s16 + $0x20] sm:$0xff] (%p526_p11), %vm259_vm0, %v1287_v55 }
 0x5e4   : >> { %v1262_v5 = vpop.f32.mrf.mxu3 }
 0x5e5   : >> { %v1273_v26 = vadd.f32 %v1262_v5, %v1209_v54 }
 0x5e6   : > { %v1288_v29 = vld [vmem:[#allocation2 + $0x28] sm:$0xff] (%p526_p11) }
 0x5e7   : >> { %1281 = vst.msk [vmem:[#allocation2 + $0x30] sm:$0xff] %vm259_vm0, %v1273_v26 }
 0x5e8   : > { %1296 = vst.msk [vmem:[%s2133_s16 + $0x28] sm:$0xff] (%p526_p11), %vm259_vm0, %v1288_v29 }
 0x5eb   : > { %528 = sbr.rel (!%p526_p11) target bundleno = 320 (0x140), region = 90 }
 0x5ec   : >> { %v1264_v16 = vpop.f32.mrf.mxu3 }
 0x5ed   : >> { %v1274_v8 = vadd.f32 %v1264_v16, %v1210_v38 }
 0x5ee   : > { %v1289_v62 = vld [vmem:[#allocation2 + $0x30] sm:$0xff] (%p526_p11) }
 0x5ef   : >> { %1282 = vst.msk [vmem:[#allocation2 + $0x38] sm:$0xff] %vm259_vm0, %v1274_v8 }
 0x5f0   : > { %1297 = vst.msk [vmem:[%s2133_s16 + $0x30] sm:$0xff] %vm259_vm0, %v1289_v62 }
 0x5f6   : > { %v1290_v63 = vld [vmem:[#allocation2 + $0x38] sm:$0xff] }
 0x5f7   : > { %1298 = vst.msk [vmem:[%s2133_s16 + $0x38] sm:$0xff] %vm259_vm0, %v1290_v63 }
 0x5f8   : > { %1602 = shalt.err (!%p1599_p4)
}
 0x5f9   : > { %s1658_s14 = smov 128   ;;  %s1659_s16 = smov 8  }
 0x5fa   : > { %1463 = dma.vmem_to_hbm [thread:$0]  (%p1733_p5), %s1313_s10, 1024, %s1315_s11, %s1300_s25, %s1658_s14, %s1658_s14, %s1659_s16  }
 0x5fb PF: > { %p1469_p7 = scmp.ge.s32.totalorder %s1641_s24, 2  ;;  %s1329_s28 = sand.u32 1, %s1629_s21  }
 0x5fc   : > { %s1330_s29 = scalar_lea.sflag [#allocation4], %s1329_s28 }
 0x5fd   : > { %p1466_p8 = pnand %p1469_p7, %p1737_p6 }
 0x5ff   : > { %p1467_p9 = pneg %p1466_p8 }
 0x601   : > { %1624 = dma.done.wait (%p1467_p9), %s1330_s29, 1024  }
 0x602   : > { %1626 = vsyncadd (%p1467_p9), %s1330_s29, 4294966272  ;;  %p16_p10 = scmp.ge.s32.totalorder %s1720_s27, 4   ;;  %s2675_s21 = smov %s1633_s22 }
 0x603   : > { %s2676_s22 = smov %s1637_s23  ;;  %s2677_s23 = smov %s1731_s30 }
 0x604   : > { %s2678_s24 = smov %s1720_s27  ;;  %18 = sbr.rel (!%p16_p10) target bundleno = 3 (0x3), region = 101 }
 0x609   :  { %1336 = vsyncpa [#allocation4], 1 }
 0x60a   :  { %1338 = vsyncpa [#allocation4 + $0x1], 1 }

</bundles_post_ra>
